<compile_context>
chip_gen: v7x
topology: tpu7x:2x2x1
jax: 0.10.0
libtpu: 0.0.40
codegen_flags: <defaults>
</compile_context>

<pallas_src>
import jax
import jax.numpy as jnp
from jax.experimental import pallas as pl
from jax.experimental.pallas import tpu as pltpu

BN_EPS = 1e-5


def _round_up(x, m):
    return (x + m - 1) // m * m


def _largest_divisor(n, candidates):
    for c in candidates:
        if n % c == 0:
            return c
    return n


def _pad_axis(a, size, axis):
    pads = [(0, 0)] * a.ndim
    pads[axis] = (0, size - a.shape[axis])
    return jnp.pad(a, pads)


# ------------------------------ Pallas kernels --------------------------------

def _matmul_bn_swish_kernel(x_ref, w_ref, s_ref, b_ref, o_ref, acc_ref):
    """o = swish((x @ w) * scale + shift), K tiles accumulated in f32 scratch."""
    @pl.when(pl.program_id(2) == 0)
    def _():
        acc_ref[...] = jnp.zeros_like(acc_ref)

    acc_ref[...] += jnp.dot(x_ref[...], w_ref[...],
                            preferred_element_type=jnp.float32)

    @pl.when(pl.program_id(2) == pl.num_programs(2) - 1)
    def _():
        y = acc_ref[...] * s_ref[...] + b_ref[...]
        sig = pl.reciprocal(1.0 + jnp.exp(-y))          # exp + rcp on the EUP
        o_ref[...] = (y * sig).astype(o_ref.dtype)


def _dw_bn_swish_add_kernel(xp_ref, w_ref, s_ref, b_ref, res_ref, o_ref):
    """Per-channel 3x3 depthwise conv + BN + swish + residual add (pure VPU).

    xp_ref : (1, H+2, W+2, C)  spatially zero-padded hidden activation
    w_ref  : (9, 1, C)         per-channel tap weights (dh*3+dw major)
    s/b    : (1, C)            folded BatchNorm scale / shift
    res_ref: (1, H, W, C)      residual (ResBlock input)
    """
    _, h, w, _ = o_ref.shape
    acc = jnp.zeros(o_ref.shape, jnp.float32)
    for dh in range(3):
        for dw in range(3):
            tap = w_ref[dh * 3 + dw]                      # (1, C)
            acc = acc + xp_ref[:, dh:dh + h, dw:dw + w, :] * tap
    y = acc * s_ref[...] + b_ref[...]
    sig = pl.reciprocal(1.0 + jnp.exp(-y))
    o_ref[...] = (y * sig + res_ref[...]).astype(o_ref.dtype)


# ------------------------------ kernel wrappers --------------------------------

def fused_matmul_bn_swish(x, w, scale, shift):
    """x:(M,K) f32, w:(K,N) bf16, scale/shift:(1,N) f32 -> swish(x@w*s+b):(M,N) f32.

    K and N are already multiples of 128 (channel-padded weights)."""
    M, K = x.shape
    _, N = w.shape

    Mp = _round_up(M, 8)
    if Mp <= 512:
        tm = Mp
    else:
        tm = 512
        Mp = _round_up(Mp, 512)
    tn = N if N <= 1024 else _largest_divisor(N, (1024, 512, 256, 128))
    tk = K if K <= 2048 else _largest_divisor(K, (2048, 1024, 512, 384, 256, 128))

    xb = x.astype(jnp.bfloat16)                 # MXU inputs in bf16, f32 accumulate
    if Mp != M:
        xb = jnp.pad(xb, ((0, Mp - M), (0, 0)))

    out = pl.pallas_call(
        _matmul_bn_swish_kernel,
        out_shape=jax.ShapeDtypeStruct((Mp, N), jnp.float32),
        grid_spec=pltpu.PrefetchScalarGridSpec(
            num_scalar_prefetch=0,
            grid=(Mp // tm, N // tn, K // tk),
            in_specs=[
                pl.BlockSpec((tm, tk), lambda i, j, k: (i, k)),
                pl.BlockSpec((tk, tn), lambda i, j, k: (k, j)),
                pl.BlockSpec((1, tn), lambda i, j, k: (0, j)),
                pl.BlockSpec((1, tn), lambda i, j, k: (0, j)),
            ],
            out_specs=pl.BlockSpec((tm, tn), lambda i, j, k: (i, j)),
            scratch_shapes=[pltpu.VMEM((tm, tn), jnp.float32)],
        ),
        compiler_params=pltpu.CompilerParams(
            dimension_semantics=("parallel", "parallel", "arbitrary")),
    )(xb, w, scale, shift)
    return out if Mp == M else out[:M]


def dw3x3_bn_swish_add(h, res, p):
    """Depthwise 3x3 (stride 1, pad 1) + BN + swish + residual add.  NHWC."""
    n, hh, ww, c = h.shape
    hp = jnp.pad(h, ((0, 0), (1, 1), (1, 1), (0, 0)))
    return pl.pallas_call(
        _dw_bn_swish_add_kernel,
        out_shape=jax.ShapeDtypeStruct((n, hh, ww, c), jnp.float32),
        grid_spec=pltpu.PrefetchScalarGridSpec(
            num_scalar_prefetch=0,
            grid=(n,),
            in_specs=[
                pl.BlockSpec((1, hh + 2, ww + 2, c), lambda i: (i, 0, 0, 0)),
                pl.BlockSpec((9, 1, c), lambda i: (0, 0, 0)),
                pl.BlockSpec((1, c), lambda i: (0, 0)),
                pl.BlockSpec((1, c), lambda i: (0, 0)),
                pl.BlockSpec((1, hh, ww, c), lambda i: (i, 0, 0, 0)),
            ],
            out_specs=pl.BlockSpec((1, hh, ww, c), lambda i: (i, 0, 0, 0)),
        ),
        compiler_params=pltpu.CompilerParams(
            dimension_semantics=("parallel",)),
    )(hp, p["w"], p["scale"], p["shift"], res)


# ------------------------------ conv layer wrappers ----------------------------

def conv1x1_bn_swish(x, p):
    """1x1 Conv + BN + Swish.  x: (N,H,W,Cp) channel-padded NHWC."""
    n, h, w, c = x.shape
    y = fused_matmul_bn_swish(x.reshape(-1, c), p["w"], p["scale"], p["shift"])
    return y.reshape(n, h, w, -1)


def conv3x3_s2_bn_swish(x, p):
    """3x3 stride-2 Conv + BN + Swish (downsample).  x: (N,H,W,Cp) NHWC."""
    n, h, w, c = x.shape
    ho = (h - 1) // 2 + 1
    wo = (w - 1) // 2 + 1
    xp = jnp.pad(x, ((0, 0), (1, 1), (1, 1), (0, 0)))
    # TODO(synk): move this 9-tap gather into the matmul kernel (tap grid axis
    # with offset index_maps) to avoid the 9x activation duplication in HBM.
    taps = [xp[:, dh:dh + 2 * ho:2, dw:dw + 2 * wo:2, :]
            for dh in range(3) for dw in range(3)]
    patches = jnp.concatenate(taps, axis=-1)              # (N, Ho, Wo, 9*Cp)
    y = fused_matmul_bn_swish(patches.reshape(-1, 9 * c),
                              p["w"], p["scale"], p["shift"])
    return y.reshape(n, ho, wo, -1)


# ------------------------------ parameter packing ------------------------------

def _bn_affine(cout):
    # Inference-mode BN with deterministic init: mean=0, var=1, gamma=1, beta=0.
    scale = jnp.full((cout,), 1.0, jnp.float32) / jnp.sqrt(1.0 + BN_EPS)
    shift = jnp.zeros((cout,), jnp.float32)
    return scale, shift


def _kaiming(key, shape, fan_in):
    return jax.random.normal(key, shape, jnp.float32) * jnp.sqrt(2.0 / fan_in)


def _pack_affine(scale, shift, cout_pad):
    s = _pad_axis(scale, cout_pad, 0).reshape(1, cout_pad)
    b = _pad_axis(shift, cout_pad, 0).reshape(1, cout_pad)
    return s, b


def _pack_1x1(w_t, scale, shift, cin_pad, cout_pad, row_index=None):
    """w_t: torch layout (cout, cin).  row_index maps torch input channel ->
    padded row position (defaults to identity).  Padded rows/cols are zero."""
    cout, cin = w_t.shape
    if row_index is None:
        row_index = jnp.arange(cin)
    wp = jnp.zeros((cin_pad, cout_pad), jnp.float32)
    wp = wp.at[row_index, :cout].set(jnp.transpose(w_t))
    s, b = _pack_affine(scale, shift, cout_pad)
    return {"w": wp.astype(jnp.bfloat16), "scale": s, "shift": b}


def _pack_3x3(w_t, scale, shift, cin_pad, cout_pad):
    """w_t: (cout, cin, 3, 3) -> (9*cin_pad, cout_pad), tap-major rows."""
    cout, cin = w_t.shape[:2]
    wk = jnp.transpose(w_t, (2, 3, 1, 0)).reshape(9, cin, cout)
    wp = jnp.zeros((9, cin_pad, cout_pad), jnp.float32)
    wp = wp.at[:, :cin, :cout].set(wk)
    wp = wp.reshape(9 * cin_pad, cout_pad)
    s, b = _pack_affine(scale, shift, cout_pad)
    return {"w": wp.astype(jnp.bfloat16), "scale": s, "shift": b}


def _pack_dw(w_t, scale, shift, cout_pad):
    """w_t: (cout, 1, 3, 3) depthwise -> (9, 1, cout_pad) per-channel taps."""
    cout = w_t.shape[0]
    wk = jnp.transpose(w_t[:, 0], (1, 2, 0)).reshape(9, cout)   # [dh*3+dw, o]
    wp = jnp.zeros((9, 1, cout_pad), jnp.float32)
    wp = wp.at[:, 0, :cout].set(wk)
    s, b = _pack_affine(scale, shift, cout_pad)
    return {"w": wp, "scale": s, "shift": b}


def init_resblock(key, channels):
    """ResBlock(channels): Conv(C, C//2, 1) -> Conv_DW(C//2, C, 3) -> +x."""
    hidden = channels // 2
    cpad = _round_up(channels, 128)
    k1, k2 = jax.random.split(key)

    # 1x1 conv: duplicate its output columns (and BN params) so the following
    # grouped conv (groups=hidden, multiplier 2: out ch o reads in ch o//2)
    # becomes a true per-channel depthwise conv on the lane axis.
    w1 = _kaiming(k1, (hidden, channels), channels)             # fan_in = cin*1*1
    s1, b1 = _bn_affine(hidden)
    w1e = jnp.repeat(w1, 2, axis=0)                             # (C, C)
    s1e, b1e = jnp.repeat(s1, 2), jnp.repeat(b1, 2)
    conv1 = _pack_1x1(w1e, s1e, b1e, cpad, cpad)

    # grouped conv torch weight (C, 1, 3, 3); fan_in = (cin/groups)*k*k = 9.
    wd = _kaiming(k2, (channels, 1, 3, 3), 9)
    sd, bd = _bn_affine(channels)
    dw = _pack_dw(wd, sd, bd, cpad)
    return {"conv1": conv1, "dw": dw}


def init_bigresblock(key, in_channels, out_channels, block_nums):
    half = out_channels // 2
    keys = jax.random.split(key, block_nums + 4)
    icp = _round_up(in_channels, 128)
    ocp = _round_up(out_channels, 128)
    cp = _round_up(half, 128)

    wdn = _kaiming(keys[0], (out_channels, in_channels, 3, 3), in_channels * 9)
    down = _pack_3x3(wdn, *_bn_affine(out_channels), icp, ocp)

    w0 = _kaiming(keys[1], (half, out_channels), out_channels)
    conv0 = _pack_1x1(w0, *_bn_affine(half), ocp, cp)

    blocks = [init_resblock(keys[2 + i], half) for i in range(block_nums)]

    wt = _kaiming(keys[2 + block_nums], (half, half), half)
    tail = _pack_1x1(wt, *_bn_affine(half), cp, cp)

    # conv1x1 consumes concat([x1, x0]); map torch input channel j to its
    # position in the padded concat layout ([0:cp] = x1, [cp:2cp] = x0).
    w11 = _kaiming(keys[3 + block_nums], (out_channels, out_channels),
                   out_channels)
    row_index = jnp.concatenate([jnp.arange(half), cp + jnp.arange(half)])
    conv1x1 = _pack_1x1(w11, *_bn_affine(out_channels), 2 * cp, ocp,
                        row_index=row_index)

    return {"down": down, "conv0": conv0, "blocks": blocks, "tail": tail,
            "conv1x1": conv1x1}


# ------------------------------ model forward ----------------------------------

def resblock_forward(x, p):
    h = conv1x1_bn_swish(x, p["conv1"])        # duplicated-column hidden, width C
    # TODO(synk): fuse the 1x1 conv, the depthwise conv and the residual add of
    # a whole ResBlock into a single pallas_call (activation resident in VMEM).
    return dw3x3_bn_swish_add(h, x, p["dw"])   # depthwise + BN + swish + add


def bigresblock_forward(x_nchw, params, out_channels):
    x = jnp.transpose(x_nchw, (0, 2, 3, 1)).astype(jnp.float32)   # NCHW -> NHWC
    x = _pad_axis(x, _round_up(x.shape[-1], 128), 3)              # lane-dense C

    x = conv3x3_s2_bn_swish(x, params["down"])       # downsample, stride 2
    x0 = conv1x1_bn_swish(x, params["conv0"])        # (N,Ho,Wo,pad(C/2))
    x1 = x0
    for bp in params["blocks"]:
        x1 = resblock_forward(x1, bp)
    x1 = conv1x1_bn_swish(x1, params["tail"])
    xc = jnp.concatenate([x1, x0], axis=-1)          # torch.cat(dim=1) in NHWC
    y = conv1x1_bn_swish(xc, params["conv1x1"])
    y = y[..., :out_channels]                        # drop channel padding once
    return jnp.transpose(y, (0, 3, 1, 2))            # back to NCHW


# ------------------------------ main --------------------------------------------

if __name__ == "__main__":
    key = jax.random.PRNGKey(0)
    pkey, xkey = jax.random.split(key)

    IN_CHANNELS, OUT_CHANNELS, BLOCK_NUMS = 16, 32, 2
    params = init_bigresblock(pkey, IN_CHANNELS, OUT_CHANNELS, BLOCK_NUMS)
    x = jax.random.normal(xkey, (2, IN_CHANNELS, 16, 16), jnp.float32)

    fwd = jax.jit(bigresblock_forward, static_argnums=2)
    out = fwd(x, params, OUT_CHANNELS)
    jax.block_until_ready(out)

    assert out.shape == (2, OUT_CHANNELS, 8, 8), out.shape
    assert bool(jnp.all(jnp.isfinite(out)))
    print("KERNEL_OK")
</pallas_src>

<mosaic_0001>
module attributes {stable_mosaic.version = 11 : i64} {
  func.func @_matmul_bn_swish_kernel(%arg0: i32, %arg1: i32, %arg2: i32, %arg3: memref<128x1152xbf16, #tpu.memory_space<vmem>>, %arg4: memref<1152x128xbf16, #tpu.memory_space<vmem>>, %arg5: memref<1x128xf32, #tpu.memory_space<vmem>>, %arg6: memref<1x128xf32, #tpu.memory_space<vmem>>, %arg7: memref<128x128xf32, #tpu.memory_space<vmem>>, %arg8: memref<128x128xf32, #tpu.memory_space<vmem>>) attributes {dimension_semantics = [#tpu.dimension_semantics<parallel>, #tpu.dimension_semantics<parallel>, #tpu.dimension_semantics<arbitrary>], iteration_bounds = array<i64: 1, 1, 1>, scalar_prefetch = 0 : i64, scratch_operands = 1 : i64, tpu.core_type = #tpu.core_type<tc>, window_params = [{transform_indices = @transform_0, window_bounds = array<i64: 128, 1152>}, {transform_indices = @transform_1, window_bounds = array<i64: 1152, 128>}, {transform_indices = @transform_2, window_bounds = array<i64: 1, 128>}, {transform_indices = @transform_3, window_bounds = array<i64: 1, 128>}, {transform_indices = @transform_4, window_bounds = array<i64: 128, 128>}]} {
    %c0_i32 = arith.constant 0 : i32
    %0 = arith.cmpi eq, %arg2, %c0_i32 : i32
    %1 = arith.extui %0 : i1 to i32
    %c0_i32_0 = arith.constant 0 : i32
    %2 = arith.cmpi ne, %1, %c0_i32_0 : i32
    scf.if %2 {
      %cst_10 = arith.constant 0.000000e+00 : f32
      %12 = vector.broadcast %cst_10 : f32 to vector<128x128xf32>
      %c0_11 = arith.constant 0 : index
      %c0_12 = arith.constant 0 : index
      %13 = vector.load %arg8[%c0_11, %c0_12] : memref<128x128xf32, #tpu.memory_space<vmem>>, vector<128x128xf32>
      tpu.vector_store %arg8[%c0_11, %c0_12], %12 {strides = array<i32>} : memref<128x128xf32, #tpu.memory_space<vmem>>, vector<128x128xf32>,
    } else {
    }
    %c0 = arith.constant 0 : index
    %c0_1 = arith.constant 0 : index
    %3 = vector.load %arg8[%c0, %c0_1] : memref<128x128xf32, #tpu.memory_space<vmem>>, vector<128x128xf32>
    %c0_2 = arith.constant 0 : index
    %c0_3 = arith.constant 0 : index
    %4 = vector.load %arg3[%c0_2, %c0_3] : memref<128x1152xbf16, #tpu.memory_space<vmem>>, vector<128x1152xbf16>
    %c0_4 = arith.constant 0 : index
    %c0_5 = arith.constant 0 : index
    %5 = vector.load %arg4[%c0_4, %c0_5] : memref<1152x128xbf16, #tpu.memory_space<vmem>>, vector<1152x128xbf16>
    %cst = arith.constant dense<0.000000e+00> : vector<128x128xf32>
    %6 = tpu.matmul %4, %5, %cst {dimension_numbers = #tpu.dot_dimension_numbers<[1], [0], [0], [1], [0, 0, 1, 1], [], []>} : vector<128x1152xbf16>, vector<1152x128xbf16>, vector<128x128xf32> -> vector<128x128xf32>
    %7 = arith.addf %3, %6 : vector<128x128xf32>
    %c0_6 = arith.constant 0 : index
    %c0_7 = arith.constant 0 : index
    %8 = vector.load %arg8[%c0_6, %c0_7] : memref<128x128xf32, #tpu.memory_space<vmem>>, vector<128x128xf32>
    tpu.vector_store %arg8[%c0_6, %c0_7], %7 {strides = array<i32>} : memref<128x128xf32, #tpu.memory_space<vmem>>, vector<128x128xf32>,
    %c0_i32_8 = arith.constant 0 : i32
    %9 = arith.cmpi eq, %arg2, %c0_i32_8 : i32
    %10 = arith.extui %9 : i1 to i32
    %c0_i32_9 = arith.constant 0 : i32
    %11 = arith.cmpi ne, %10, %c0_i32_9 : i32
    scf.if %11 {
      %c0_10 = arith.constant 0 : index
      %c0_11 = arith.constant 0 : index
      %12 = vector.load %arg8[%c0_10, %c0_11] : memref<128x128xf32, #tpu.memory_space<vmem>>, vector<128x128xf32>
      %c0_12 = arith.constant 0 : index
      %c0_13 = arith.constant 0 : index
      %13 = vector.load %arg5[%c0_12, %c0_13] : memref<1x128xf32, #tpu.memory_space<vmem>>, vector<1x128xf32>
      %14 = vector.broadcast %13 : vector<1x128xf32> to vector<128x128xf32>
      %15 = arith.mulf %12, %14 : vector<128x128xf32>
      %c0_14 = arith.constant 0 : index
      %c0_15 = arith.constant 0 : index
      %16 = vector.load %arg6[%c0_14, %c0_15] : memref<1x128xf32, #tpu.memory_space<vmem>>, vector<1x128xf32>
      %17 = vector.broadcast %16 : vector<1x128xf32> to vector<128x128xf32>
      %18 = arith.addf %15, %17 : vector<128x128xf32>
      %cst_16 = arith.constant 0.000000e+00 : f32
      %19 = vector.broadcast %cst_16 : f32 to vector<128x128xf32>
      %20 = arith.subf %19, %18 : vector<128x128xf32>
      %21 = math.exp %20 : vector<128x128xf32>
      %cst_17 = arith.constant 1.000000e+00 : f32
      %22 = vector.broadcast %cst_17 : f32 to vector<128x128xf32>
      %23 = arith.addf %22, %21 : vector<128x128xf32>
      %24 = tpu.reciprocal %23 : vector<128x128xf32> -> vector<128x128xf32>
      %25 = arith.mulf %18, %24 : vector<128x128xf32>
      %c0_18 = arith.constant 0 : index
      %c0_19 = arith.constant 0 : index
      %26 = vector.load %arg7[%c0_18, %c0_19] : memref<128x128xf32, #tpu.memory_space<vmem>>, vector<128x128xf32>
      tpu.vector_store %arg7[%c0_18, %c0_19], %25 {strides = array<i32>} : memref<128x128xf32, #tpu.memory_space<vmem>>, vector<128x128xf32>,
    } else {
    }
    return
  }
  func.func @transform_0(%arg0: i32, %arg1: i32, %arg2: i32) -> (i32, i32) {
    %c0_i32 = arith.constant 0 : i32
    return %arg0, %arg2 : i32, i32
  }
  func.func @transform_1(%arg0: i32, %arg1: i32, %arg2: i32) -> (i32, i32) {
    %c0_i32 = arith.constant 0 : i32
    return %arg2, %arg1 : i32, i32
  }
  func.func @transform_2(%arg0: i32, %arg1: i32, %arg2: i32) -> (i32, i32) {
    %c0_i32 = arith.constant 0 : i32
    %c0_i32_0 = arith.constant 0 : i32
    return %c0_i32, %arg1 : i32, i32
  }
  func.func @transform_3(%arg0: i32, %arg1: i32, %arg2: i32) -> (i32, i32) {
    %c0_i32 = arith.constant 0 : i32
    %c0_i32_0 = arith.constant 0 : i32
    return %c0_i32, %arg1 : i32, i32
  }
  func.func @transform_4(%arg0: i32, %arg1: i32, %arg2: i32) -> (i32, i32) {
    %c0_i32 = arith.constant 0 : i32
    return %arg0, %arg1 : i32, i32
  }
}

module attributes {stable_mosaic.version = 11 : i64} {
  func.func @_matmul_bn_swish_kernel(%arg0: i32, %arg1: i32, %arg2: i32, %arg3: memref<128x128xbf16, #tpu.memory_space<vmem>>, %arg4: memref<128x128xbf16, #tpu.memory_space<vmem>>, %arg5: memref<1x128xf32, #tpu.memory_space<vmem>>, %arg6: memref<1x128xf32, #tpu.memory_space<vmem>>, %arg7: memref<128x128xf32, #tpu.memory_space<vmem>>, %arg8: memref<128x128xf32, #tpu.memory_space<vmem>>) attributes {dimension_semantics = [#tpu.dimension_semantics<parallel>, #tpu.dimension_semantics<parallel>, #tpu.dimension_semantics<arbitrary>], iteration_bounds = array<i64: 1, 1, 1>, scalar_prefetch = 0 : i64, scratch_operands = 1 : i64, tpu.core_type = #tpu.core_type<tc>, window_params = [{transform_indices = @transform_0, window_bounds = array<i64: 128, 128>}, {transform_indices = @transform_1, window_bounds = array<i64: 128, 128>}, {transform_indices = @transform_2, window_bounds = array<i64: 1, 128>}, {transform_indices = @transform_3, window_bounds = array<i64: 1, 128>}, {transform_indices = @transform_4, window_bounds = array<i64: 128, 128>}]} {
    %c0_i32 = arith.constant 0 : i32
    %0 = arith.cmpi eq, %arg2, %c0_i32 : i32
    %1 = arith.extui %0 : i1 to i32
    %c0_i32_0 = arith.constant 0 : i32
    %2 = arith.cmpi ne, %1, %c0_i32_0 : i32
    scf.if %2 {
      %cst_10 = arith.constant 0.000000e+00 : f32
      %12 = vector.broadcast %cst_10 : f32 to vector<128x128xf32>
      %c0_11 = arith.constant 0 : index
      %c0_12 = arith.constant 0 : index
      %13 = vector.load %arg8[%c0_11, %c0_12] : memref<128x128xf32, #tpu.memory_space<vmem>>, vector<128x128xf32>
      tpu.vector_store %arg8[%c0_11, %c0_12], %12 {strides = array<i32>} : memref<128x128xf32, #tpu.memory_space<vmem>>, vector<128x128xf32>,
    } else {
    }
    %c0 = arith.constant 0 : index
    %c0_1 = arith.constant 0 : index
    %3 = vector.load %arg8[%c0, %c0_1] : memref<128x128xf32, #tpu.memory_space<vmem>>, vector<128x128xf32>
    %c0_2 = arith.constant 0 : index
    %c0_3 = arith.constant 0 : index
    %4 = vector.load %arg3[%c0_2, %c0_3] : memref<128x128xbf16, #tpu.memory_space<vmem>>, vector<128x128xbf16>
    %c0_4 = arith.constant 0 : index
    %c0_5 = arith.constant 0 : index
    %5 = vector.load %arg4[%c0_4, %c0_5] : memref<128x128xbf16, #tpu.memory_space<vmem>>, vector<128x128xbf16>
    %cst = arith.constant dense<0.000000e+00> : vector<128x128xf32>
    %6 = tpu.matmul %4, %5, %cst {dimension_numbers = #tpu.dot_dimension_numbers<[1], [0], [0], [1], [0, 0, 1, 1], [], []>} : vector<128x128xbf16>, vector<128x128xbf16>, vector<128x128xf32> -> vector<128x128xf32>
    %7 = arith.addf %3, %6 : vector<128x128xf32>
    %c0_6 = arith.constant 0 : index
    %c0_7 = arith.constant 0 : index
    %8 = vector.load %arg8[%c0_6, %c0_7] : memref<128x128xf32, #tpu.memory_space<vmem>>, vector<128x128xf32>
    tpu.vector_store %arg8[%c0_6, %c0_7], %7 {strides = array<i32>} : memref<128x128xf32, #tpu.memory_space<vmem>>, vector<128x128xf32>,
    %c0_i32_8 = arith.constant 0 : i32
    %9 = arith.cmpi eq, %arg2, %c0_i32_8 : i32
    %10 = arith.extui %9 : i1 to i32
    %c0_i32_9 = arith.constant 0 : i32
    %11 = arith.cmpi ne, %10, %c0_i32_9 : i32
    scf.if %11 {
      %c0_10 = arith.constant 0 : index
      %c0_11 = arith.constant 0 : index
      %12 = vector.load %arg8[%c0_10, %c0_11] : memref<128x128xf32, #tpu.memory_space<vmem>>, vector<128x128xf32>
      %c0_12 = arith.constant 0 : index
      %c0_13 = arith.constant 0 : index
      %13 = vector.load %arg5[%c0_12, %c0_13] : memref<1x128xf32, #tpu.memory_space<vmem>>, vector<1x128xf32>
      %14 = vector.broadcast %13 : vector<1x128xf32> to vector<128x128xf32>
      %15 = arith.mulf %12, %14 : vector<128x128xf32>
      %c0_14 = arith.constant 0 : index
      %c0_15 = arith.constant 0 : index
      %16 = vector.load %arg6[%c0_14, %c0_15] : memref<1x128xf32, #tpu.memory_space<vmem>>, vector<1x128xf32>
      %17 = vector.broadcast %16 : vector<1x128xf32> to vector<128x128xf32>
      %18 = arith.addf %15, %17 : vector<128x128xf32>
      %cst_16 = arith.constant 0.000000e+00 : f32
      %19 = vector.broadcast %cst_16 : f32 to vector<128x128xf32>
      %20 = arith.subf %19, %18 : vector<128x128xf32>
      %21 = math.exp %20 : vector<128x128xf32>
      %cst_17 = arith.constant 1.000000e+00 : f32
      %22 = vector.broadcast %cst_17 : f32 to vector<128x128xf32>
      %23 = arith.addf %22, %21 : vector<128x128xf32>
      %24 = tpu.reciprocal %23 : vector<128x128xf32> -> vector<128x128xf32>
      %25 = arith.mulf %18, %24 : vector<128x128xf32>
      %c0_18 = arith.constant 0 : index
      %c0_19 = arith.constant 0 : index
      %26 = vector.load %arg7[%c0_18, %c0_19] : memref<128x128xf32, #tpu.memory_space<vmem>>, vector<128x128xf32>
      tpu.vector_store %arg7[%c0_18, %c0_19], %25 {strides = array<i32>} : memref<128x128xf32, #tpu.memory_space<vmem>>, vector<128x128xf32>,
    } else {
    }
    return
  }
  func.func @transform_0(%arg0: i32, %arg1: i32, %arg2: i32) -> (i32, i32) {
    %c0_i32 = arith.constant 0 : i32
    return %arg0, %arg2 : i32, i32
  }
  func.func @transform_1(%arg0: i32, %arg1: i32, %arg2: i32) -> (i32, i32) {
    %c0_i32 = arith.constant 0 : i32
    return %arg2, %arg1 : i32, i32
  }
  func.func @transform_2(%arg0: i32, %arg1: i32, %arg2: i32) -> (i32, i32) {
    %c0_i32 = arith.constant 0 : i32
    %c0_i32_0 = arith.constant 0 : i32
    return %c0_i32, %arg1 : i32, i32
  }
  func.func @transform_3(%arg0: i32, %arg1: i32, %arg2: i32) -> (i32, i32) {
    %c0_i32 = arith.constant 0 : i32
    %c0_i32_0 = arith.constant 0 : i32
    return %c0_i32, %arg1 : i32, i32
  }
  func.func @transform_4(%arg0: i32, %arg1: i32, %arg2: i32) -> (i32, i32) {
    %c0_i32 = arith.constant 0 : i32
    return %arg0, %arg1 : i32, i32
  }
}

module attributes {stable_mosaic.version = 11 : i64} {
  func.func @_dw_bn_swish_add_kernel(%arg0: i32, %arg1: memref<1x10x10x128xf32, #tpu.memory_space<vmem>>, %arg2: memref<9x1x128xf32, #tpu.memory_space<vmem>>, %arg3: memref<1x128xf32, #tpu.memory_space<vmem>>, %arg4: memref<1x128xf32, #tpu.memory_space<vmem>>, %arg5: memref<1x8x8x128xf32, #tpu.memory_space<vmem>>, %arg6: memref<1x8x8x128xf32, #tpu.memory_space<vmem>>) attributes {dimension_semantics = [#tpu.dimension_semantics<parallel>], iteration_bounds = array<i64: 2>, scalar_prefetch = 0 : i64, scratch_operands = 0 : i64, tpu.core_type = #tpu.core_type<tc>, window_params = [{transform_indices = @transform_0, window_bounds = array<i64: 1, 10, 10, 128>}, {pipeline_mode = #tpu.pipeline_mode<synchronous>, transform_indices = @transform_1, window_bounds = array<i64: 9, 1, 128>}, {pipeline_mode = #tpu.pipeline_mode<synchronous>, transform_indices = @transform_2, window_bounds = array<i64: 1, 128>}, {pipeline_mode = #tpu.pipeline_mode<synchronous>, transform_indices = @transform_3, window_bounds = array<i64: 1, 128>}, {transform_indices = @transform_4, window_bounds = array<i64: 1, 8, 8, 128>}, {transform_indices = @transform_5, window_bounds = array<i64: 1, 8, 8, 128>}]} {
    %cst = arith.constant 0.000000e+00 : f32
    %0 = vector.broadcast %cst : f32 to vector<1x8x8x128xf32>
    %c0 = arith.constant 0 : index
    %c0_0 = arith.constant 0 : index
    %c0_1 = arith.constant 0 : index
    %1 = vector.load %arg2[%c0, %c0_0, %c0_1] : memref<9x1x128xf32, #tpu.memory_space<vmem>>, vector<1x1x128xf32>
    %2 = vector.shape_cast %1 : vector<1x1x128xf32> to vector<1x128xf32>
    %c0_2 = arith.constant 0 : index
    %c0_3 = arith.constant 0 : index
    %c0_4 = arith.constant 0 : index
    %c0_5 = arith.constant 0 : index
    %3 = vector.load %arg1[%c0_2, %c0_3, %c0_4, %c0_5] : memref<1x10x10x128xf32, #tpu.memory_space<vmem>>, vector<1x8x8x128xf32>
    %4 = vector.shape_cast %2 : vector<1x128xf32> to vector<1x1x1x128xf32>
    %5 = vector.broadcast %4 : vector<1x1x1x128xf32> to vector<1x8x8x128xf32>
    %6 = arith.mulf %3, %5 : vector<1x8x8x128xf32>
    %7 = arith.addf %0, %6 : vector<1x8x8x128xf32>
    %c1 = arith.constant 1 : index
    %c0_6 = arith.constant 0 : index
    %c0_7 = arith.constant 0 : index
    %8 = vector.load %arg2[%c1, %c0_6, %c0_7] : memref<9x1x128xf32, #tpu.memory_space<vmem>>, vector<1x1x128xf32>
    %9 = vector.shape_cast %8 : vector<1x1x128xf32> to vector<1x128xf32>
    %c0_8 = arith.constant 0 : index
    %c0_9 = arith.constant 0 : index
    %c1_10 = arith.constant 1 : index
    %c0_11 = arith.constant 0 : index
    %10 = vector.load %arg1[%c0_8, %c0_9, %c1_10, %c0_11] : memref<1x10x10x128xf32, #tpu.memory_space<vmem>>, vector<1x8x8x128xf32>
    %11 = vector.shape_cast %9 : vector<1x128xf32> to vector<1x1x1x128xf32>
    %12 = vector.broadcast %11 : vector<1x1x1x128xf32> to vector<1x8x8x128xf32>
    %13 = arith.mulf %10, %12 : vector<1x8x8x128xf32>
    %14 = arith.addf %7, %13 : vector<1x8x8x128xf32>
    %c2 = arith.constant 2 : index
    %c0_12 = arith.constant 0 : index
    %c0_13 = arith.constant 0 : index
    %15 = vector.load %arg2[%c2, %c0_12, %c0_13] : memref<9x1x128xf32, #tpu.memory_space<vmem>>, vector<1x1x128xf32>
    %16 = vector.shape_cast %15 : vector<1x1x128xf32> to vector<1x128xf32>
    %c0_14 = arith.constant 0 : index
    %c0_15 = arith.constant 0 : index
    %c2_16 = arith.constant 2 : index
    %c0_17 = arith.constant 0 : index
    %17 = vector.load %arg1[%c0_14, %c0_15, %c2_16, %c0_17] : memref<1x10x10x128xf32, #tpu.memory_space<vmem>>, vector<1x8x8x128xf32>
    %18 = vector.shape_cast %16 : vector<1x128xf32> to vector<1x1x1x128xf32>
    %19 = vector.broadcast %18 : vector<1x1x1x128xf32> to vector<1x8x8x128xf32>
    %20 = arith.mulf %17, %19 : vector<1x8x8x128xf32>
    %21 = arith.addf %14, %20 : vector<1x8x8x128xf32>
    %c3 = arith.constant 3 : index
    %c0_18 = arith.constant 0 : index
    %c0_19 = arith.constant 0 : index
    %22 = vector.load %arg2[%c3, %c0_18, %c0_19] : memref<9x1x128xf32, #tpu.memory_space<vmem>>, vector<1x1x128xf32>
    %23 = vector.shape_cast %22 : vector<1x1x128xf32> to vector<1x128xf32>
    %c0_20 = arith.constant 0 : index
    %c1_21 = arith.constant 1 : index
    %c0_22 = arith.constant 0 : index
    %c0_23 = arith.constant 0 : index
    %24 = vector.load %arg1[%c0_20, %c1_21, %c0_22, %c0_23] : memref<1x10x10x128xf32, #tpu.memory_space<vmem>>, vector<1x8x8x128xf32>
    %25 = vector.shape_cast %23 : vector<1x128xf32> to vector<1x1x1x128xf32>
    %26 = vector.broadcast %25 : vector<1x1x1x128xf32> to vector<1x8x8x128xf32>
    %27 = arith.mulf %24, %26 : vector<1x8x8x128xf32>
    %28 = arith.addf %21, %27 : vector<1x8x8x128xf32>
    %c4 = arith.constant 4 : index
    %c0_24 = arith.constant 0 : index
    %c0_25 = arith.constant 0 : index
    %29 = vector.load %arg2[%c4, %c0_24, %c0_25] : memref<9x1x128xf32, #tpu.memory_space<vmem>>, vector<1x1x128xf32>
    %30 = vector.shape_cast %29 : vector<1x1x128xf32> to vector<1x128xf32>
    %c0_26 = arith.constant 0 : index
    %c1_27 = arith.constant 1 : index
    %c1_28 = arith.constant 1 : index
    %c0_29 = arith.constant 0 : index
    %31 = vector.load %arg1[%c0_26, %c1_27, %c1_28, %c0_29] : memref<1x10x10x128xf32, #tpu.memory_space<vmem>>, vector<1x8x8x128xf32>
    %32 = vector.shape_cast %30 : vector<1x128xf32> to vector<1x1x1x128xf32>
    %33 = vector.broadcast %32 : vector<1x1x1x128xf32> to vector<1x8x8x128xf32>
    %34 = arith.mulf %31, %33 : vector<1x8x8x128xf32>
    %35 = arith.addf %28, %34 : vector<1x8x8x128xf32>
    %c5 = arith.constant 5 : index
    %c0_30 = arith.constant 0 : index
    %c0_31 = arith.constant 0 : index
    %36 = vector.load %arg2[%c5, %c0_30, %c0_31] : memref<9x1x128xf32, #tpu.memory_space<vmem>>, vector<1x1x128xf32>
    %37 = vector.shape_cast %36 : vector<1x1x128xf32> to vector<1x128xf32>
    %c0_32 = arith.constant 0 : index
    %c1_33 = arith.constant 1 : index
    %c2_34 = arith.constant 2 : index
    %c0_35 = arith.constant 0 : index
    %38 = vector.load %arg1[%c0_32, %c1_33, %c2_34, %c0_35] : memref<1x10x10x128xf32, #tpu.memory_space<vmem>>, vector<1x8x8x128xf32>
    %39 = vector.shape_cast %37 : vector<1x128xf32> to vector<1x1x1x128xf32>
    %40 = vector.broadcast %39 : vector<1x1x1x128xf32> to vector<1x8x8x128xf32>
    %41 = arith.mulf %38, %40 : vector<1x8x8x128xf32>
    %42 = arith.addf %35, %41 : vector<1x8x8x128xf32>
    %c6 = arith.constant 6 : index
    %c0_36 = arith.constant 0 : index
    %c0_37 = arith.constant 0 : index
    %43 = vector.load %arg2[%c6, %c0_36, %c0_37] : memref<9x1x128xf32, #tpu.memory_space<vmem>>, vector<1x1x128xf32>
    %44 = vector.shape_cast %43 : vector<1x1x128xf32> to vector<1x128xf32>
    %c0_38 = arith.constant 0 : index
    %c2_39 = arith.constant 2 : index
    %c0_40 = arith.constant 0 : index
    %c0_41 = arith.constant 0 : index
    %45 = vector.load %arg1[%c0_38, %c2_39, %c0_40, %c0_41] : memref<1x10x10x128xf32, #tpu.memory_space<vmem>>, vector<1x8x8x128xf32>
    %46 = vector.shape_cast %44 : vector<1x128xf32> to vector<1x1x1x128xf32>
    %47 = vector.broadcast %46 : vector<1x1x1x128xf32> to vector<1x8x8x128xf32>
    %48 = arith.mulf %45, %47 : vector<1x8x8x128xf32>
    %49 = arith.addf %42, %48 : vector<1x8x8x128xf32>
    %c7 = arith.constant 7 : index
    %c0_42 = arith.constant 0 : index
    %c0_43 = arith.constant 0 : index
    %50 = vector.load %arg2[%c7, %c0_42, %c0_43] : memref<9x1x128xf32, #tpu.memory_space<vmem>>, vector<1x1x128xf32>
    %51 = vector.shape_cast %50 : vector<1x1x128xf32> to vector<1x128xf32>
    %c0_44 = arith.constant 0 : index
    %c2_45 = arith.constant 2 : index
    %c1_46 = arith.constant 1 : index
    %c0_47 = arith.constant 0 : index
    %52 = vector.load %arg1[%c0_44, %c2_45, %c1_46, %c0_47] : memref<1x10x10x128xf32, #tpu.memory_space<vmem>>, vector<1x8x8x128xf32>
    %53 = vector.shape_cast %51 : vector<1x128xf32> to vector<1x1x1x128xf32>
    %54 = vector.broadcast %53 : vector<1x1x1x128xf32> to vector<1x8x8x128xf32>
    %55 = arith.mulf %52, %54 : vector<1x8x8x128xf32>
    %56 = arith.addf %49, %55 : vector<1x8x8x128xf32>
    %c8 = arith.constant 8 : index
    %c0_48 = arith.constant 0 : index
    %c0_49 = arith.constant 0 : index
    %57 = vector.load %arg2[%c8, %c0_48, %c0_49] : memref<9x1x128xf32, #tpu.memory_space<vmem>>, vector<1x1x128xf32>
    %58 = vector.shape_cast %57 : vector<1x1x128xf32> to vector<1x128xf32>
    %c0_50 = arith.constant 0 : index
    %c2_51 = arith.constant 2 : index
    %c2_52 = arith.constant 2 : index
    %c0_53 = arith.constant 0 : index
    %59 = vector.load %arg1[%c0_50, %c2_51, %c2_52, %c0_53] : memref<1x10x10x128xf32, #tpu.memory_space<vmem>>, vector<1x8x8x128xf32>
    %60 = vector.shape_cast %58 : vector<1x128xf32> to vector<1x1x1x128xf32>
    %61 = vector.broadcast %60 : vector<1x1x1x128xf32> to vector<1x8x8x128xf32>
    %62 = arith.mulf %59, %61 : vector<1x8x8x128xf32>
    %63 = arith.addf %56, %62 : vector<1x8x8x128xf32>
    %c0_54 = arith.constant 0 : index
    %c0_55 = arith.constant 0 : index
    %64 = vector.load %arg3[%c0_54, %c0_55] : memref<1x128xf32, #tpu.memory_space<vmem>>, vector<1x128xf32>
    %65 = vector.shape_cast %64 : vector<1x128xf32> to vector<1x1x1x128xf32>
    %66 = vector.broadcast %65 : vector<1x1x1x128xf32> to vector<1x8x8x128xf32>
    %67 = arith.mulf %63, %66 : vector<1x8x8x128xf32>
    %c0_56 = arith.constant 0 : index
    %c0_57 = arith.constant 0 : index
    %68 = vector.load %arg4[%c0_56, %c0_57] : memref<1x128xf32, #tpu.memory_space<vmem>>, vector<1x128xf32>
    %69 = vector.shape_cast %68 : vector<1x128xf32> to vector<1x1x1x128xf32>
    %70 = vector.broadcast %69 : vector<1x1x1x128xf32> to vector<1x8x8x128xf32>
    %71 = arith.addf %67, %70 : vector<1x8x8x128xf32>
    %cst_58 = arith.constant 0.000000e+00 : f32
    %72 = vector.broadcast %cst_58 : f32 to vector<1x8x8x128xf32>
    %73 = arith.subf %72, %71 : vector<1x8x8x128xf32>
    %74 = math.exp %73 : vector<1x8x8x128xf32>
    %cst_59 = arith.constant 1.000000e+00 : f32
    %75 = vector.broadcast %cst_59 : f32 to vector<1x8x8x128xf32>
    %76 = arith.addf %75, %74 : vector<1x8x8x128xf32>
    %77 = tpu.reciprocal %76 : vector<1x8x8x128xf32> -> vector<1x8x8x128xf32>
    %78 = arith.mulf %71, %77 : vector<1x8x8x128xf32>
    %c0_60 = arith.constant 0 : index
    %c0_61 = arith.constant 0 : index
    %c0_62 = arith.constant 0 : index
    %c0_63 = arith.constant 0 : index
    %79 = vector.load %arg5[%c0_60, %c0_61, %c0_62, %c0_63] : memref<1x8x8x128xf32, #tpu.memory_space<vmem>>, vector<1x8x8x128xf32>
    %80 = arith.addf %78, %79 : vector<1x8x8x128xf32>
    %c0_64 = arith.constant 0 : index
    %c0_65 = arith.constant 0 : index
    %c0_66 = arith.constant 0 : index
    %c0_67 = arith.constant 0 : index
    %81 = vector.load %arg6[%c0_64, %c0_65, %c0_66, %c0_67] : memref<1x8x8x128xf32, #tpu.memory_space<vmem>>, vector<1x8x8x128xf32>
    tpu.vector_store %arg6[%c0_64, %c0_65, %c0_66, %c0_67], %80 {strides = array<i32>} : memref<1x8x8x128xf32, #tpu.memory_space<vmem>>, vector<1x8x8x128xf32>,
    return
  }
  func.func @transform_0(%arg0: i32) -> (i32, i32, i32, i32) {
    %c0_i32 = arith.constant 0 : i32
    %c0_i32_0 = arith.constant 0 : i32
    %c0_i32_1 = arith.constant 0 : i32
    %c0_i32_2 = arith.constant 0 : i32
    return %arg0, %c0_i32, %c0_i32_0, %c0_i32_1 : i32, i32, i32, i32
  }
  func.func @transform_1(%arg0: i32) -> (i32, i32, i32) {
    %c0_i32 = arith.constant 0 : i32
    %c0_i32_0 = arith.constant 0 : i32
    %c0_i32_1 = arith.constant 0 : i32
    %c0_i32_2 = arith.constant 0 : i32
    return %c0_i32, %c0_i32_0, %c0_i32_1 : i32, i32, i32
  }
  func.func @transform_2(%arg0: i32) -> (i32, i32) {
    %c0_i32 = arith.constant 0 : i32
    %c0_i32_0 = arith.constant 0 : i32
    %c0_i32_1 = arith.constant 0 : i32
    return %c0_i32, %c0_i32_0 : i32, i32
  }
  func.func @transform_3(%arg0: i32) -> (i32, i32) {
    %c0_i32 = arith.constant 0 : i32
    %c0_i32_0 = arith.constant 0 : i32
    %c0_i32_1 = arith.constant 0 : i32
    return %c0_i32, %c0_i32_0 : i32, i32
  }
  func.func @transform_4(%arg0: i32) -> (i32, i32, i32, i32) {
    %c0_i32 = arith.constant 0 : i32
    %c0_i32_0 = arith.constant 0 : i32
    %c0_i32_1 = arith.constant 0 : i32
    %c0_i32_2 = arith.constant 0 : i32
    return %arg0, %c0_i32, %c0_i32_0, %c0_i32_1 : i32, i32, i32, i32
  }
  func.func @transform_5(%arg0: i32) -> (i32, i32, i32, i32) {
    %c0_i32 = arith.constant 0 : i32
    %c0_i32_0 = arith.constant 0 : i32
    %c0_i32_1 = arith.constant 0 : i32
    %c0_i32_2 = arith.constant 0 : i32
    return %arg0, %c0_i32, %c0_i32_0, %c0_i32_1 : i32, i32, i32, i32
  }
}

module attributes {stable_mosaic.version = 11 : i64} {
  func.func @_matmul_bn_swish_kernel(%arg0: i32, %arg1: i32, %arg2: i32, %arg3: memref<128x256xbf16, #tpu.memory_space<vmem>>, %arg4: memref<256x128xbf16, #tpu.memory_space<vmem>>, %arg5: memref<1x128xf32, #tpu.memory_space<vmem>>, %arg6: memref<1x128xf32, #tpu.memory_space<vmem>>, %arg7: memref<128x128xf32, #tpu.memory_space<vmem>>, %arg8: memref<128x128xf32, #tpu.memory_space<vmem>>) attributes {dimension_semantics = [#tpu.dimension_semantics<parallel>, #tpu.dimension_semantics<parallel>, #tpu.dimension_semantics<arbitrary>], iteration_bounds = array<i64: 1, 1, 1>, scalar_prefetch = 0 : i64, scratch_operands = 1 : i64, tpu.core_type = #tpu.core_type<tc>, window_params = [{transform_indices = @transform_0, window_bounds = array<i64: 128, 256>}, {transform_indices = @transform_1, window_bounds = array<i64: 256, 128>}, {transform_indices = @transform_2, window_bounds = array<i64: 1, 128>}, {transform_indices = @transform_3, window_bounds = array<i64: 1, 128>}, {transform_indices = @transform_4, window_bounds = array<i64: 128, 128>}]} {
    %c0_i32 = arith.constant 0 : i32
    %0 = arith.cmpi eq, %arg2, %c0_i32 : i32
    %1 = arith.extui %0 : i1 to i32
    %c0_i32_0 = arith.constant 0 : i32
    %2 = arith.cmpi ne, %1, %c0_i32_0 : i32
    scf.if %2 {
      %cst_10 = arith.constant 0.000000e+00 : f32
      %12 = vector.broadcast %cst_10 : f32 to vector<128x128xf32>
      %c0_11 = arith.constant 0 : index
      %c0_12 = arith.constant 0 : index
      %13 = vector.load %arg8[%c0_11, %c0_12] : memref<128x128xf32, #tpu.memory_space<vmem>>, vector<128x128xf32>
      tpu.vector_store %arg8[%c0_11, %c0_12], %12 {strides = array<i32>} : memref<128x128xf32, #tpu.memory_space<vmem>>, vector<128x128xf32>,
    } else {
    }
    %c0 = arith.constant 0 : index
    %c0_1 = arith.constant 0 : index
    %3 = vector.load %arg8[%c0, %c0_1] : memref<128x128xf32, #tpu.memory_space<vmem>>, vector<128x128xf32>
    %c0_2 = arith.constant 0 : index
    %c0_3 = arith.constant 0 : index
    %4 = vector.load %arg3[%c0_2, %c0_3] : memref<128x256xbf16, #tpu.memory_space<vmem>>, vector<128x256xbf16>
    %c0_4 = arith.constant 0 : index
    %c0_5 = arith.constant 0 : index
    %5 = vector.load %arg4[%c0_4, %c0_5] : memref<256x128xbf16, #tpu.memory_space<vmem>>, vector<256x128xbf16>
    %cst = arith.constant dense<0.000000e+00> : vector<128x128xf32>
    %6 = tpu.matmul %4, %5, %cst {dimension_numbers = #tpu.dot_dimension_numbers<[1], [0], [0], [1], [0, 0, 1, 1], [], []>} : vector<128x256xbf16>, vector<256x128xbf16>, vector<128x128xf32> -> vector<128x128xf32>
    %7 = arith.addf %3, %6 : vector<128x128xf32>
    %c0_6 = arith.constant 0 : index
    %c0_7 = arith.constant 0 : index
    %8 = vector.load %arg8[%c0_6, %c0_7] : memref<128x128xf32, #tpu.memory_space<vmem>>, vector<128x128xf32>
    tpu.vector_store %arg8[%c0_6, %c0_7], %7 {strides = array<i32>} : memref<128x128xf32, #tpu.memory_space<vmem>>, vector<128x128xf32>,
    %c0_i32_8 = arith.constant 0 : i32
    %9 = arith.cmpi eq, %arg2, %c0_i32_8 : i32
    %10 = arith.extui %9 : i1 to i32
    %c0_i32_9 = arith.constant 0 : i32
    %11 = arith.cmpi ne, %10, %c0_i32_9 : i32
    scf.if %11 {
      %c0_10 = arith.constant 0 : index
      %c0_11 = arith.constant 0 : index
      %12 = vector.load %arg8[%c0_10, %c0_11] : memref<128x128xf32, #tpu.memory_space<vmem>>, vector<128x128xf32>
      %c0_12 = arith.constant 0 : index
      %c0_13 = arith.constant 0 : index
      %13 = vector.load %arg5[%c0_12, %c0_13] : memref<1x128xf32, #tpu.memory_space<vmem>>, vector<1x128xf32>
      %14 = vector.broadcast %13 : vector<1x128xf32> to vector<128x128xf32>
      %15 = arith.mulf %12, %14 : vector<128x128xf32>
      %c0_14 = arith.constant 0 : index
      %c0_15 = arith.constant 0 : index
      %16 = vector.load %arg6[%c0_14, %c0_15] : memref<1x128xf32, #tpu.memory_space<vmem>>, vector<1x128xf32>
      %17 = vector.broadcast %16 : vector<1x128xf32> to vector<128x128xf32>
      %18 = arith.addf %15, %17 : vector<128x128xf32>
      %cst_16 = arith.constant 0.000000e+00 : f32
      %19 = vector.broadcast %cst_16 : f32 to vector<128x128xf32>
      %20 = arith.subf %19, %18 : vector<128x128xf32>
      %21 = math.exp %20 : vector<128x128xf32>
      %cst_17 = arith.constant 1.000000e+00 : f32
      %22 = vector.broadcast %cst_17 : f32 to vector<128x128xf32>
      %23 = arith.addf %22, %21 : vector<128x128xf32>
      %24 = tpu.reciprocal %23 : vector<128x128xf32> -> vector<128x128xf32>
      %25 = arith.mulf %18, %24 : vector<128x128xf32>
      %c0_18 = arith.constant 0 : index
      %c0_19 = arith.constant 0 : index
      %26 = vector.load %arg7[%c0_18, %c0_19] : memref<128x128xf32, #tpu.memory_space<vmem>>, vector<128x128xf32>
      tpu.vector_store %arg7[%c0_18, %c0_19], %25 {strides = array<i32>} : memref<128x128xf32, #tpu.memory_space<vmem>>, vector<128x128xf32>,
    } else {
    }
    return
  }
  func.func @transform_0(%arg0: i32, %arg1: i32, %arg2: i32) -> (i32, i32) {
    %c0_i32 = arith.constant 0 : i32
    return %arg0, %arg2 : i32, i32
  }
  func.func @transform_1(%arg0: i32, %arg1: i32, %arg2: i32) -> (i32, i32) {
    %c0_i32 = arith.constant 0 : i32
    return %arg2, %arg1 : i32, i32
  }
  func.func @transform_2(%arg0: i32, %arg1: i32, %arg2: i32) -> (i32, i32) {
    %c0_i32 = arith.constant 0 : i32
    %c0_i32_0 = arith.constant 0 : i32
    return %c0_i32, %arg1 : i32, i32
  }
  func.func @transform_3(%arg0: i32, %arg1: i32, %arg2: i32) -> (i32, i32) {
    %c0_i32 = arith.constant 0 : i32
    %c0_i32_0 = arith.constant 0 : i32
    return %c0_i32, %arg1 : i32, i32
  }
  func.func @transform_4(%arg0: i32, %arg1: i32, %arg2: i32) -> (i32, i32) {
    %c0_i32 = arith.constant 0 : i32
    return %arg0, %arg1 : i32, i32
  }
}

</mosaic_0001>

<bundles_post_ra>
// kernel: bigresblock_forward.11
= control target key start
LH: loop header
LB: loop body
LE: loop exit
PB: predicated region body
PF: predicated region fallthrough
CT: control target
= control target key end

     0   :  { %s863_s18 = smov 0   ;;  %s1106_s0 = inlined_call_operand.vmem [shape: f32[2,10,10,128], index: 0, kind: input, shape index: {}]   ;;  %s1107_s1 = inlined_call_operand.vmem [shape: f32[9,1,128], index: 1, kind: input, shape index: {}]   ;;  %s1108_s2 = inlined_call_operand.vmem [shape: f32[1,128], index: 2, kind: input, shape index: {}]   ;;  %s1109_s3 = inlined_call_operand.vmem [shape: f32[1,128], index: 3, kind: input, shape index: {}]   ;;  %s1110_s4 = inlined_call_operand.vmem [shape: f32[2,8,8,128], index: 4, kind: input, shape index: {}]   ;;  %s1111_s5 = inlined_call_operand.vmem [shape: f32[2,8,8,128], index: 5, kind: output, shape index: {}]  }
   0x1 LB: > { %s703_s19 = sadd.s32 4294967295, %s831_s18   ;;  %p707_p0 = scmp.ge.s32.totalorder %s831_s18, 1  ;;  %s831_s18 = sphi %s863_s18, %s15_s18  }
   0x2   : > { %p197_p1 = scmp.lt.s32.totalorder %s831_s18, 3 }
   0x4   : > { %p198_p2 = pnand %p707_p0, %p197_p1 }
   0x5   : > { %p230_p3 = scmp.lt.s32.totalorder (!%p198_p2), %s703_s19, 1  ;;  %v876_v0 = vld [vmem:[%s1107_s1] ss:$0 sm:$0xff] (!%p198_p2)  ;;  %v882_v1 = vld [vmem:[%s1107_s1 + $0x1] ss:$0 sm:$0xff] (!%p198_p2) }
   0x6   : > { %201 = sbr.rel (%p198_p2) target bundleno = 106 (0x6a), region = 40  ;;  %v887_v2 = vld [vmem:[%s1107_s1 + $0x2] ss:$0 sm:$0xff] (!%p198_p2)  ;;  %v892_v3 = vld [vmem:[%s1107_s1 + $0x3] ss:$0 sm:$0xff] (!%p198_p2) }
   0x7   : > { %v897_v4 = vld [vmem:[%s1107_s1 + $0x4] ss:$0 sm:$0xff] (!%p198_p2)  ;;  %v902_v5 = vld [vmem:[%s1107_s1 + $0x5] ss:$0 sm:$0xff] (!%p198_p2)  ;;  %v912_v6 = vld [vmem:[%s1107_s1 + $0x6] ss:$0 sm:$0xff] (!%p198_p2) }
   0x8   : > { %v917_v7 = vld [vmem:[%s1107_s1 + $0x7] ss:$0 sm:$0xff] (!%p198_p2)  ;;  %v922_v8 = vld [vmem:[%s1107_s1 + $0x8] ss:$0 sm:$0xff] (!%p198_p2) }
   0xd   : > { %s1113_s19 = smov (!%p230_p3, %s703_s19), 1 }
   0xe   : > { %s784_s22 = smul.u32 160, %s1113_s19  ;;  %s782_s23 = sshll.u32 %s1113_s19, 6 }
   0xf   : > { %s1070_s26 = scalar_lea.vmem %s1110_s4, %s782_s23  ;;  %s1079_s28 = scalar_lea.vmem %s1111_s5, %s782_s23 }
  0x10   : > { %s907_s10 = scalar_lea.vmem %s1106_s0, %s784_s22 }
  0x11   : > { %v246_v9 = vld [vmem:[%s907_s10] sm:$0xff]  ;;  %v719_v15 = vld [vmem:[%s907_s10 + $0x10] sm:$0xff] }
  0x12   : > { %v278_v10 = vld [vmem:[%s907_s10 + $0x1] sm:$0xff]  ;;  %v260_v12 = vmul.f32 %v876_v0, %v246_v9  ;;  %v729_v16 = vld [vmem:[%s907_s10 + $0x11] sm:$0xff]  ;;  %v357_v18 = vmul.f32 %v892_v3, %v719_v15  ;;  %v261_v20 = vmul.f32 %v719_v15, %v876_v0 }
  0x13   : > { %v310_v11 = vld [vmem:[%s907_s10 + $0x2] sm:$0xff]  ;;  %v292_v13 = vmul.f32 %v882_v1, %v278_v10  ;;  %v739_v17 = vld [vmem:[%s907_s10 + $0x12] sm:$0xff]  ;;  %v389_v22 = vmul.f32 %v897_v4, %v729_v16  ;;  %v293_v29 = vmul.f32 %v729_v16, %v882_v1 }
  0x14   : > { %v324_v14 = vmul.f32 %v887_v2, %v310_v11  ;;  %v749_v19 = vld [vmem:[%s907_s10 + $0x20] sm:$0xff]  ;;  %v421_v23 = vmul.f32 %v902_v5, %v739_v17  ;;  %v325_v30 = vmul.f32 %v739_v17, %v887_v2  ;;  %v750_v35 = vld [vmem:[%s907_s10 + $0x30] sm:$0xff] }
  0x15   : > { %v300_v21 = vadd.f32 %v292_v13, %v260_v12  ;;  %v454_v24 = vmul.f32 %v912_v6, %v749_v19  ;;  %v759_v25 = vld [vmem:[%s907_s10 + $0x21] sm:$0xff]  ;;  %v358_v32 = vmul.f32 %v749_v19, %v892_v3  ;;  %v301_v36 = vadd.f32 %v293_v29, %v261_v20  ;;  %v760_v38 = vld [vmem:[%s907_s10 + $0x31] sm:$0xff] }
  0x16   : > { %v769_v26 = vld [vmem:[%s907_s10 + $0x22] sm:$0xff]  ;;  %v486_v27 = vmul.f32 %v917_v7, %v759_v25  ;;  %v390_v33 = vmul.f32 %v759_v25, %v897_v4  ;;  %v455_v37 = vmul.f32 %v912_v6, %v750_v35  ;;  %v770_v39 = vld [vmem:[%s907_s10 + $0x32] sm:$0xff]  ;;  %v262_v40 = vmul.f32 %v749_v19, %v876_v0 }
  0x17   : > { %v518_v28 = vmul.f32 %v922_v8, %v769_v26  ;;  %v332_v31 = vadd.f32 %v324_v14, %v300_v21  ;;  %v422_v34 = vmul.f32 %v769_v26, %v902_v5  ;;  %v294_v41 = vmul.f32 %v759_v25, %v882_v1  ;;  %v751_v50 = vld [vmem:[%s907_s10 + $0x40] sm:$0xff]  ;;  %v752_v14 = vld [vmem:[%s907_s10 + $0x50] sm:$0xff] }
  0x18   : > { %v487_v43 = vmul.f32 %v917_v7, %v760_v38  ;;  %v519_v44 = vmul.f32 %v922_v8, %v770_v39  ;;  %v326_v45 = vmul.f32 %v769_v26, %v887_v2  ;;  %v333_v46 = vadd.f32 %v325_v30, %v301_v36  ;;  %v761_v57 = vld [vmem:[%s907_s10 + $0x41] sm:$0xff]  ;;  %v983_v30 = vld [vmem:[%s1108_s2] ss:$0 sm:$0xff] }
  0x19   : > { %v365_v42 = vadd.f32 %v357_v18, %v332_v31  ;;  %v302_v47 = vadd.f32 %v294_v41, %v262_v40  ;;  %v359_v48 = vmul.f32 %v750_v35, %v892_v3  ;;  %v391_v49 = vmul.f32 %v760_v38, %v897_v4  ;;  %v771_v58 = vld [vmem:[%s907_s10 + $0x42] sm:$0xff]  ;;  %v992_v40 = vld [vmem:[%s1109_s3] ss:$0 sm:$0xff] }
  0x1a   : > { %v423_v52 = vmul.f32 %v770_v39, %v902_v5  ;;  %v456_v53 = vmul.f32 %v912_v6, %v751_v50  ;;  %v263_v54 = vmul.f32 %v750_v35, %v876_v0  ;;  %v366_v55 = vadd.f32 %v358_v32, %v333_v46  ;;  %v753_v46 = vld [vmem:[%s907_s10 + $0x60] sm:$0xff] }
  0x1b   : > { %v397_v51 = vadd.f32 %v389_v22, %v365_v42  ;;  %v334_v56 = vadd.f32 %v326_v45, %v302_v47  ;;  %v295_v59 = vmul.f32 %v760_v38, %v882_v1  ;;  %v327_v60 = vmul.f32 %v770_v39, %v887_v2  ;;  %v762_v22 = vld [vmem:[%s907_s10 + $0x51] sm:$0xff] }
  0x1c   : > { %v488_v62 = vmul.f32 %v917_v7, %v761_v57  ;;  %v520_v63 = vmul.f32 %v922_v8, %v771_v58  ;;  %v360_v9 = vmul.f32 %v751_v50, %v892_v3  ;;  %v398_v10 = vadd.f32 %v390_v33, %v366_v55 }
  0x1d   : > { %v429_v61 = vadd.f32 %v421_v23, %v397_v51  ;;  %v367_v11 = vadd.f32 %v359_v48, %v334_v56  ;;  %v303_v12 = vadd.f32 %v295_v59, %v263_v54  ;;  %v392_v13 = vmul.f32 %v761_v57, %v897_v4 }
  0x1e   : > { %v424_v16 = vmul.f32 %v771_v58, %v902_v5  ;;  %v457_v17 = vmul.f32 %v912_v6, %v752_v14  ;;  %v264_v18 = vmul.f32 %v751_v50, %v876_v0  ;;  %v430_v19 = vadd.f32 %v422_v34, %v398_v10  ;;  %v772_v34 = vld [vmem:[%s907_s10 + $0x52] sm:$0xff] }
  0x1f   : > { %v462_v15 = vadd.f32 %v454_v24, %v429_v61  ;;  %v399_v20 = vadd.f32 %v391_v49, %v367_v11  ;;  %v335_v21 = vadd.f32 %v327_v60, %v303_v12  ;;  %v296_v23 = vmul.f32 %v761_v57, %v882_v1  ;;  %v763_v61 = vld [vmem:[%s907_s10 + $0x61] sm:$0xff] }
  0x20   : > { %v489_v26 = vmul.f32 %v917_v7, %v762_v22  ;;  %v328_v29 = vmul.f32 %v771_v58, %v887_v2  ;;  %v361_v24 = vmul.f32 %v752_v14, %v892_v3  ;;  %v463_v31 = vadd.f32 %v455_v37, %v430_v19 }
  0x21   : > { %v494_v25 = vadd.f32 %v486_v27, %v462_v15  ;;  %v431_v32 = vadd.f32 %v423_v52, %v399_v20  ;;  %v368_v33 = vadd.f32 %v360_v9, %v335_v21  ;;  %v304_v35 = vadd.f32 %v296_v23, %v264_v18  ;;  %v773_v15 = vld [vmem:[%s907_s10 + $0x62] sm:$0xff]  ;;  %v754_v23 = vld [vmem:[%s907_s10 + $0x70] sm:$0xff] }
  0x22   : > { %v521_v27 = vmul.f32 %v922_v8, %v772_v34  ;;  %v393_v38 = vmul.f32 %v762_v22, %v897_v4  ;;  %v425_v39 = vmul.f32 %v772_v34, %v902_v5  ;;  %v495_v41 = vadd.f32 %v487_v43, %v463_v31 }
  0x23   : > { %v526_v36 = vadd.f32 %v518_v28, %v494_v25  ;;  %v464_v42 = vadd.f32 %v456_v53, %v431_v32  ;;  %v400_v45 = vadd.f32 %v392_v13, %v368_v33  ;;  %v336_v37 = vadd.f32 %v328_v29, %v304_v35 }
  0x24   : > { %v458_v28 = vmul.f32 %v912_v6, %v753_v46  ;;  %v265_v48 = vmul.f32 %v752_v14, %v876_v0  ;;  %v297_v49 = vmul.f32 %v762_v22, %v882_v1  ;;  %v527_v50 = vadd.f32 %v519_v44, %v495_v41 }
  0x25   : > { %v541_v47 = vmul.f32 %v983_v30, %v526_v36  ;;  %v496_v51 = vadd.f32 %v488_v62, %v464_v42  ;;  %v432_v52 = vadd.f32 %v424_v16, %v400_v45  ;;  %v369_v54 = vadd.f32 %v361_v24, %v336_v37  ;;  %v774_v45 = vld [vmem:[%s907_s10 + $0x72] sm:$0xff] }
  0x26   : > { %v305_v43 = vadd.f32 %v297_v49, %v265_v48  ;;  %v329_v53 = vmul.f32 %v772_v34, %v887_v2  ;;  %v362_v56 = vmul.f32 %v753_v46, %v892_v3  ;;  %v542_v57 = vmul.f32 %v983_v30, %v527_v50  ;;  %v764_v34 = vld [vmem:[%s907_s10 + $0x71] sm:$0xff] }
  0x27   : > { %v1000_v55 = vadd.f32 %v992_v40, %v541_v47  ;;  %v528_v58 = vadd.f32 %v520_v63, %v496_v51  ;;  %v465_v59 = vadd.f32 %v457_v17, %v432_v52  ;;  %v401_v60 = vadd.f32 %v393_v38, %v369_v54  ;;  %v755_v54 = vld [vmem:[%s907_s10 + $0x80] sm:$0xff] }
  0x28   : > { %v490_v62 = vmul.f32 %v917_v7, %v763_v61  ;;  %v337_v9 = vadd.f32 %v329_v53, %v305_v43  ;;  %v394_v10 = vmul.f32 %v763_v61, %v897_v4  ;;  %v1010_v11 = vadd.f32 %v992_v40, %v542_v57 }
  0x29   : > { %v564_v44 = vsub.f32 0.0, %v1000_v55  ;;  %v543_v12 = vmul.f32 %v983_v30, %v528_v58  ;;  %v497_v13 = vadd.f32 %v489_v26, %v465_v59  ;;  %v433_v14 = vadd.f32 %v425_v39, %v401_v60 }
  0x2a   : > { %v522_v16 = vmul.f32 %v922_v8, %v773_v15  ;;  %v370_v17 = vadd.f32 %v362_v56, %v337_v9  ;;  %v426_v18 = vmul.f32 %v773_v15, %v902_v5  ;;  %v565_v19 = vsub.f32 0.0, %v1010_v11 }
  0x2b   : > { %v572_v63 = vmul.f32 1.442695, %v564_v44  ;;  %v1018_v20 = vadd.f32 %v992_v40, %v543_v12  ;;  %v529_v21 = vadd.f32 %v521_v27, %v497_v13  ;;  %v466_v22 = vadd.f32 %v458_v28, %v433_v14  ;;  %v775_v14 = vld [vmem:[%s907_s10 + $0x82] sm:$0xff] }
  0x2c   : > { %v402_v25 = vadd.f32 %v394_v10, %v370_v17  ;;  %v459_v26 = vmul.f32 %v912_v6, %v754_v23  ;;  %v266_v29 = vmul.f32 %v753_v46, %v876_v0  ;;  %v574_v24 = vmul.f32 1.442695, %v565_v19 }
  0x2d   : > { %793 = vpow2.f32 %v572_v63  ;;  %v566_v31 = vsub.f32 0.0, %v1018_v20  ;;  %v544_v32 = vmul.f32 %v983_v30, %v529_v21  ;;  %v498_v33 = vadd.f32 %v490_v62, %v466_v22 }
  0x2e   : > { %v434_v35 = vadd.f32 %v426_v18, %v402_v25  ;;  %v491_v36 = vmul.f32 %v917_v7, %v764_v34  ;;  %v298_v27 = vmul.f32 %v763_v61, %v882_v1  ;;  %v330_v38 = vmul.f32 %v773_v15, %v887_v2  ;;  %v765_v61 = vld [vmem:[%s907_s10 + $0x81] sm:$0xff] }
  0x2f   : > { %795 = vpow2.f32 %v574_v24  ;;  %v576_v39 = vmul.f32 1.442695, %v566_v31  ;;  %v1030_v41 = vadd.f32 %v992_v40, %v544_v32  ;;  %v530_v42 = vadd.f32 %v522_v16, %v498_v33  ;;  %v766_v24 = vld [vmem:[%s907_s10 + $0x91] sm:$0xff] }
  0x30   : > { %v467_v37 = vadd.f32 %v459_v26, %v434_v35  ;;  %v523_v46 = vmul.f32 %v922_v8, %v774_v45  ;;  %v306_v47 = vadd.f32 %v298_v27, %v266_v29  ;;  %v363_v28 = vmul.f32 %v754_v23, %v892_v3  ;;  %v776_v27 = vld [vmem:[%s907_s10 + $0x92] sm:$0xff] }
  0x31   : > { %797 = vpow2.f32 %v576_v39  ;;  %v567_v48 = vsub.f32 0.0, %v1030_v41  ;;  %v545_v49 = vmul.f32 %v983_v30, %v530_v42  ;;  %v395_v52 = vmul.f32 %v764_v34, %v897_v4 }
  0x32   : > { %v499_v50 = vadd.f32 %v491_v36, %v467_v37  ;;  %v338_v51 = vadd.f32 %v330_v38, %v306_v47  ;;  %v267_v56 = vmul.f32 %v754_v23, %v876_v0  ;;  %v299_v57 = vmul.f32 %v764_v34, %v882_v1 }
  0x33   : > { %v578_v43 = vmul.f32 1.442695, %v567_v48  ;;  %v1040_v53 = vadd.f32 %v992_v40, %v545_v49  ;;  %v427_v60 = vmul.f32 %v774_v45, %v902_v5  ;;  %v331_v44 = vmul.f32 %v774_v45, %v887_v2  ;;  %v612_v48 = vld [vmem:[%s1070_s26] sm:$0xff] }
  0x34   : > { %v531_v58 = vadd.f32 %v523_v46, %v499_v50  ;;  %v371_v59 = vadd.f32 %v363_v28, %v338_v51  ;;  %v307_v9 = vadd.f32 %v299_v57, %v267_v56  ;;  %v364_v10 = vmul.f32 %v755_v54, %v892_v3  ;;  %v756_v3 = vld [vmem:[%s907_s10 + $0x90] sm:$0xff]  ;;  %v613_v57 = vld [vmem:[%s1070_s26 + $0x8] sm:$0xff] }
  0x35   : > { %799 = vpow2.f32 %v578_v43  ;;  %v568_v62 = vsub.f32 0.0, %v1040_v53  ;;  %v460_v1 = vmul.f32 %v912_v6, %v755_v54  ;;  %v396_v2 = vmul.f32 %v765_v61, %v897_v4 }
  0x36   : > { %v546_v13 = vmul.f32 %v983_v30, %v531_v58  ;;  %v403_v0 = vadd.f32 %v395_v52, %v371_v59  ;;  %v339_v16 = vadd.f32 %v331_v44, %v307_v9  ;;  %v492_v19 = vmul.f32 %v917_v7, %v765_v61  ;;  %v614_v61 = vld [vmem:[%s1070_s26 + $0x10] sm:$0xff] }
  0x37   : > { %v794_v12 = vpop.eup %793  ;;  %v580_v63 = vmul.f32 1.442695, %v568_v62  ;;  %v524_v22 = vmul.f32 %v922_v8, %v775_v14  ;;  %v428_v25 = vmul.f32 %v775_v14, %v902_v5  ;;  %v461_v33 = vmul.f32 %v912_v6, %v756_v3 }
  0x38   : > { %v588_v15 = vadd.f32 1.0, %v794_v12  ;;  %v1054_v17 = vadd.f32 %v992_v40, %v546_v13  ;;  %v435_v18 = vadd.f32 %v427_v60, %v403_v0  ;;  %v372_v23 = vadd.f32 %v364_v10, %v339_v16  ;;  %v615_v0 = vld [vmem:[%s1070_s26 + $0x18] sm:$0xff] }
  0x39   : > { %v796_v21 = vpop.eup %795  ;;  %v493_v39 = vmul.f32 %v917_v7, %v766_v24  ;;  %v525_v37 = vmul.f32 %v922_v8, %v776_v27 }
  0x3a   : > { %801 = vrcp.f32 %v588_v15  ;;  %v589_v26 = vadd.f32 1.0, %v796_v21  ;;  %v569_v4 = vsub.f32 0.0, %v1054_v17  ;;  %v468_v29 = vadd.f32 %v460_v1, %v435_v18  ;;  %v616_v15 = vld [vmem:[%s1070_s26 + $0x20] sm:$0xff] }
  0x3b   : > { %803 = vpow2.f32 %v580_v63  ;;  %v798_v31 = vpop.eup %797  ;;  %v404_v32 = vadd.f32 %v396_v2, %v372_v23 }
  0x3c   : > { %805 = vrcp.f32 %v589_v26  ;;  %v590_v34 = vadd.f32 1.0, %v798_v31  ;;  %v582_v35 = vmul.f32 1.442695, %v569_v4  ;;  %v500_v36 = vadd.f32 %v492_v19, %v468_v29  ;;  %v617_v19 = vld [vmem:[%s1070_s26 + $0x28] sm:$0xff]  ;;  %v619_v29 = vld [vmem:[%s1070_s26 + $0x38] sm:$0xff] }
  0x3d   : > { %v436_v38 = vadd.f32 %v428_v25, %v404_v32  ;;  %v618_v25 = vld [vmem:[%s1070_s26 + $0x30] sm:$0xff] }
  0x3e   : > { %807 = vrcp.f32 %v590_v34  ;;  %v532_v5 = vadd.f32 %v524_v22, %v500_v36 }
  0x3f   : > { %v800_v42 = vpop.eup %799  ;;  %809 = vpow2.f32 %v582_v35  ;;  %v469_v45 = vadd.f32 %v461_v33, %v436_v38 }
  0x40   : > { %v591_v6 = vadd.f32 1.0, %v800_v42  ;;  %v547_v46 = vmul.f32 %v983_v30, %v532_v5 }
  0x41   : > { %v501_v47 = vadd.f32 %v493_v39, %v469_v45 }
  0x42   : > { %811 = vrcp.f32 %v591_v6  ;;  %v562_v7 = vadd.f32 %v992_v40, %v547_v46 }
  0x43   : > { %v533_v49 = vadd.f32 %v525_v37, %v501_v47 }
  0x44   : > { %v802_v28 = vpop.eup %801  ;;  %v570_v51 = vsub.f32 0.0, %v562_v7 }
  0x45   : > { %v804_v50 = vpop.eup %803  ;;  %v604_v8 = vmul.f32 %v802_v28, %v1000_v55  ;;  %v548_v54 = vmul.f32 %v983_v30, %v533_v49 }
  0x46   : > { %v592_v52 = vadd.f32 1.0, %v804_v50  ;;  %v806_v43 = vpop.eup %805  ;;  %v584_v58 = vmul.f32 1.442695, %v570_v51 }
  0x47   : > { %v620_v56 = vadd.f32 %v612_v48, %v604_v8  ;;  %v605_v59 = vmul.f32 %v806_v43, %v1010_v11  ;;  %v563_v55 = vadd.f32 %v992_v40, %v548_v54 }
  0x48   : > { %813 = vrcp.f32 %v592_v52  ;;  %v808_v60 = vpop.eup %807 }
  0x49   : > { %628 = vst [vmem:[%s1079_s28] sm:$0xff] %v620_v56  ;;  %815 = vpow2.f32 %v584_v58  ;;  %v810_v44 = vpop.eup %809  ;;  %v621_v62 = vadd.f32 %v613_v57, %v605_v59  ;;  %v606_v30 = vmul.f32 %v808_v60, %v1018_v20  ;;  %v571_v9 = vsub.f32 0.0, %v563_v55 }
  0x4a   : > { %v593_v10 = vadd.f32 1.0, %v810_v44 }
  0x4b   : > { %629 = vst [vmem:[%s1079_s28 + $0x8] sm:$0xff] %v621_v62  ;;  %v622_v12 = vadd.f32 %v614_v61, %v606_v30  ;;  %v586_v11 = vmul.f32 1.442695, %v571_v9 }
  0x4c   : > { %v812_v13 = vpop.eup %811  ;;  %817 = vrcp.f32 %v593_v10 }
  0x4d   : > { %630 = vst [vmem:[%s1079_s28 + $0x10] sm:$0xff] %v622_v12  ;;  %v607_v40 = vmul.f32 %v812_v13, %v1030_v41  ;;  %819 = vpow2.f32 %v586_v11 }
  0x4f   : > { %v623_v1 = vadd.f32 %v615_v0, %v607_v40 }
  0x51   : > { %631 = vst [vmem:[%s1079_s28 + $0x18] sm:$0xff] %v623_v1 }
  0x52   : > { %v814_v14 = vpop.eup %813 }
  0x53   : > { %v816_v20 = vpop.eup %815  ;;  %v608_v63 = vmul.f32 %v814_v14, %v1040_v53 }
  0x54   : > { %v594_v16 = vadd.f32 1.0, %v816_v20 }
  0x55   : > { %v624_v2 = vadd.f32 %v616_v15, %v608_v63 }
  0x56   : > { %821 = vrcp.f32 %v594_v16  ;;  %v818_v18 = vpop.eup %817 }
  0x57   : > { %632 = vst [vmem:[%s1079_s28 + $0x20] sm:$0xff] %v624_v2  ;;  %v820_v41 = vpop.eup %819  ;;  %v609_v3 = vmul.f32 %v818_v18, %v1054_v17 }
  0x58   : > { %v595_v21 = vadd.f32 1.0, %v820_v41 }
  0x59   : > { %v625_v22 = vadd.f32 %v617_v19, %v609_v3 }
  0x5a   : > { %823 = vrcp.f32 %v595_v21 }
  0x5b   : > { %633 = vst [vmem:[%s1079_s28 + $0x28] sm:$0xff] %v625_v22 }
  0x60   : > { %v822_v23 = vpop.eup %821 }
  0x61   : > { %v610_v26 = vmul.f32 %v822_v23, %v562_v7 }
  0x63   : > { %v626_v53 = vadd.f32 %v618_v25, %v610_v26 }
  0x64   : > { %v824_v4 = vpop.eup %823 }
  0x65   : > { %634 = vst [vmem:[%s1079_s28 + $0x30] sm:$0xff] %v626_v53  ;;  %v611_v24 = vmul.f32 %v824_v4, %v563_v55 }
  0x67   : > { %v627_v31 = vadd.f32 %v619_v29, %v611_v24 }
  0x69   : > { %635 = vst [vmem:[%s1079_s28 + $0x38] sm:$0xff] %v627_v31 }
  0x6a PF: > { %s15_s18 = sadd.s32 1, %s831_s18  }
  0x6b   : > { %p12_p4 = scmp.ge.s32.totalorder %s15_s18, 4  }
  0x6d   :  { %14 = sbr.rel (!%p12_p4) target bundleno = 1 (0x1), region = 83 }

// kernel: bigresblock_forward.9
= control target key start
LH: loop header
LB: loop body
LE: loop exit
PB: predicated region body
PF: predicated region fallthrough
CT: control target
= control target key end

     0   :  { %s881_s1 = inlined_call_operand.vmem [shape: bf16[128,128], index: 1, kind: input, shape index: {}]   ;;  %s882_s0 = inlined_call_operand.vmem [shape: bf16[128,128], index: 0, kind: input, shape index: {}]   ;;  %s883_s2 = inlined_call_operand.vmem [shape: f32[1,128], index: 2, kind: input, shape index: {}]   ;;  %s884_s3 = inlined_call_operand.vmem [shape: f32[1,128], index: 3, kind: input, shape index: {}]   ;;  %s885_s4 = inlined_call_operand.vmem [shape: f32[128,128], index: 4, kind: output, shape index: {}]  }
   0x1   :  { %v574_v0 = vld [vmem:[%s881_s1] sm:$0xff]   ;;  %v575_v1 = vld [vmem:[%s881_s1 + $0x8] sm:$0xff]   ;;  %v576_v2 = vld [vmem:[%s881_s1 + $0x10] sm:$0xff]  }
   0x2   :  { %526 = vmatprep.subr.bf16.mxu0 %v574_v0  ;;  %558 = vmatprep.subr.bf16.mxu1 %v574_v0  ;;  %v577_v3 = vld [vmem:[%s881_s1 + $0x18] sm:$0xff]   ;;  %v582_v4 = vld [vmem:[%s882_s0] sm:$0xff]   ;;  %v579_v7 = vld [vmem:[%s881_s1 + $0x28] sm:$0xff]  }
   0x3   :  { %527 = vmatpush3.bf16.msra.mxu0 %v574_v0  ;;  %566 = vmatpush3.bf16.msra.mxu1 %v574_v0  ;;  %v583_v5 = vld [vmem:[%s882_s0 + $0x20] sm:$0xff]   ;;  %v580_v8 = vld [vmem:[%s881_s1 + $0x30] sm:$0xff]   ;;  %v581_v9 = vld [vmem:[%s881_s1 + $0x38] sm:$0xff]  }
   0x4   :  { %528 = vmatprep.subr.bf16.mxu0 %v575_v1  ;;  %559 = vmatprep.subr.bf16.mxu1 %v575_v1  ;;  %v578_v6 = vld [vmem:[%s881_s1 + $0x20] sm:$0xff]   ;;  %v584_v10 = vld [vmem:[%s882_s0 + $0x8] sm:$0xff]   ;;  %v586_v12 = vld [vmem:[%s882_s0 + $0x10] sm:$0xff]  }
   0x5   :  { %542 = vmatprep.mubr.bf16.mxu0 %v582_v4  ;;  %550 = vmatprep.mubr.bf16.mxu1 %v583_v5  ;;  %v585_v11 = vld [vmem:[%s882_s0 + $0x28] sm:$0xff]   ;;  %v587_v13 = vld [vmem:[%s882_s0 + $0x30] sm:$0xff]   ;;  %v588_v14 = vld [vmem:[%s882_s0 + $0x18] sm:$0xff]  }
   0x6   :  { %v589_v15 = vld [vmem:[%s882_s0 + $0x38] sm:$0xff]   ;;  %v730_v16 = vld [vmem:[%s883_s2] ss:$0 sm:$0xff] }
   0x7   :  { %529 = vmatpush3.bf16.msra.mxu0 %v575_v1  ;;  %567 = vmatpush3.bf16.msra.mxu1 %v575_v1  ;;  %v735_v18 = vld [vmem:[%s884_s3] ss:$0 sm:$0xff] }
   0x8   :  { %530 = vmatprep.subr.bf16.mxu0 %v576_v2  ;;  %560 = vmatprep.subr.bf16.mxu1 %v576_v2 }
   0xb   :  { %531 = vmatpush3.bf16.msra.mxu0 %v576_v2  ;;  %568 = vmatpush3.bf16.msra.mxu1 %v576_v2 }
   0xc   :  { %532 = vmatprep.subr.bf16.mxu0 %v577_v3  ;;  %561 = vmatprep.subr.bf16.mxu1 %v577_v3 }
   0xf   :  { %533 = vmatpush3.bf16.msra.mxu0 %v577_v3  ;;  %569 = vmatpush3.bf16.msra.mxu1 %v577_v3 }
  0x10   :  { %534 = vmatprep.subr.bf16.mxu0 %v578_v6  ;;  %562 = vmatprep.subr.bf16.mxu1 %v578_v6 }
  0x13   :  { %535 = vmatpush3.bf16.msra.mxu0 %v578_v6  ;;  %570 = vmatpush3.bf16.msra.mxu1 %v578_v6 }
  0x14   :  { %536 = vmatprep.subr.bf16.mxu0 %v579_v7  ;;  %563 = vmatprep.subr.bf16.mxu1 %v579_v7 }
  0x17   :  { %537 = vmatpush3.bf16.msra.mxu0 %v579_v7  ;;  %571 = vmatpush3.bf16.msra.mxu1 %v579_v7 }
  0x18   :  { %538 = vmatprep.subr.bf16.mxu0 %v580_v8  ;;  %564 = vmatprep.subr.bf16.mxu1 %v580_v8 }
  0x1b   :  { %539 = vmatpush3.bf16.msra.mxu0 %v580_v8  ;;  %572 = vmatpush3.bf16.msra.mxu1 %v580_v8 }
  0x1c   :  { %540 = vmatprep.subr.bf16.mxu0 %v581_v9  ;;  %565 = vmatprep.subr.bf16.mxu1 %v581_v9 }
  0x1f   :  { %541 = vmatpush3.bf16.msra.mxu0 %v581_v9  ;;  %573 = vmatpush3.bf16.msra.mxu1 %v581_v9 }
  0x22   :  { %543 = vmatmul.mubr.bf16.vlgmr.msra.gmra.mrb[0].mxu0 %v584_v10  ;;  %551 = vmatmul.mubr.bf16.vlgmr.msra.gmra.mrb[0].mxu1 %v585_v11 }
  0x23   :  { %546 = vmatprep.mubr.bf16.mxu0 %v586_v12  ;;  %554 = vmatprep.mubr.bf16.mxu1 %v587_v13 }
  0x2a   :  { %547 = vmatmul.mubr.bf16.gmra.mrb[4].mxu0 %v588_v14  ;;  %555 = vmatmul.mubr.bf16.gmra.mrb[4].mxu1 %v589_v15 }
  0xf5   :  { %v544_v17 = vpop.f32.mrb[0].mxu0  ;;  %v552_v19 = vpop.f32.mrb[0].mxu1 }
  0xf6   :  { %v339_v20 = vmul.f32 %v544_v17, %v730_v16  ;;  %v347_v21 = vmul.f32 %v552_v19, %v730_v16  ;;  %v216_v22 = vpop.f32.mrb[1].mxu0  ;;  %v248_v23 = vpop.f32.mrb[1].mxu1 }
  0xf7   :  { %v337_v24 = vmul.f32 %v730_v16, %v216_v22  ;;  %v345_v25 = vmul.f32 %v730_v16, %v248_v23  ;;  %v545_v26 = vpop.f32.mrb[2].mxu0  ;;  %v553_v27 = vpop.f32.mrb[2].mxu1 }
  0xf8   :  { %v742_v28 = vadd.f32 %v735_v18, %v339_v20  ;;  %v745_v29 = vadd.f32 %v735_v18, %v347_v21  ;;  %v340_v30 = vmul.f32 %v545_v26, %v730_v16  ;;  %v348_v31 = vmul.f32 %v553_v27, %v730_v16  ;;  %v219_v32 = vpop.f32.mrb[3].mxu0  ;;  %v251_v33 = vpop.f32.mrb[3].mxu1 }
  0xf9   :  { %v750_v34 = vadd.f32 %v735_v18, %v337_v24  ;;  %v753_v35 = vadd.f32 %v735_v18, %v345_v25  ;;  %v338_v36 = vmul.f32 %v730_v16, %v219_v32  ;;  %v346_v37 = vmul.f32 %v730_v16, %v251_v33 }
  0xfa   :  { %v378_v38 = vsub.f32 0.0, %v742_v28  ;;  %v386_v39 = vsub.f32 0.0, %v745_v29  ;;  %v760_v40 = vadd.f32 %v735_v18, %v340_v30  ;;  %v763_v41 = vadd.f32 %v735_v18, %v348_v31 }
  0xfb   :  { %v376_v42 = vsub.f32 0.0, %v750_v34  ;;  %v384_v43 = vsub.f32 0.0, %v753_v35  ;;  %v768_v44 = vadd.f32 %v735_v18, %v338_v36  ;;  %v771_v45 = vadd.f32 %v735_v18, %v346_v37 }
  0xfc   :  { %v396_v46 = vmul.f32 1.442695, %v378_v38  ;;  %v412_v47 = vmul.f32 1.442695, %v386_v39  ;;  %v379_v48 = vsub.f32 0.0, %v760_v40  ;;  %v387_v49 = vsub.f32 0.0, %v763_v41 }
  0xfd   :  { %v392_v50 = vmul.f32 1.442695, %v376_v42  ;;  %v408_v51 = vmul.f32 1.442695, %v384_v43  ;;  %v377_v52 = vsub.f32 0.0, %v768_v44  ;;  %v385_v53 = vsub.f32 0.0, %v771_v45 }
  0xfe   :  { %590 = vpow2.f32 %v396_v46  ;;  %v398_v54 = vmul.f32 1.442695, %v379_v48  ;;  %v548_v55 = vpop.f32.mrb[4].mxu0  ;;  %v556_v56 = vpop.f32.mrb[4].mxu1  ;;  %v414_v57 = vmul.f32 1.442695, %v387_v49 }
  0xff   :  { %592 = vpow2.f32 %v412_v47  ;;  %v394_v58 = vmul.f32 1.442695, %v377_v52  ;;  %v343_v59 = vmul.f32 %v548_v55, %v730_v16  ;;  %v232_v60 = vpop.f32.mrb[5].mxu0  ;;  %v264_v61 = vpop.f32.mrb[5].mxu1  ;;  %v351_v62 = vmul.f32 %v556_v56, %v730_v16 }
 0x100   :  { %594 = vpow2.f32 %v392_v50  ;;  %v341_v63 = vmul.f32 %v730_v16, %v232_v60  ;;  %v349_v0 = vmul.f32 %v730_v16, %v264_v61  ;;  %v549_v1 = vpop.f32.mrb[6].mxu0  ;;  %v557_v2 = vpop.f32.mrb[6].mxu1  ;;  %v410_v3 = vmul.f32 1.442695, %v385_v53 }
 0x101   :  { %596 = vpow2.f32 %v408_v51  ;;  %v782_v4 = vadd.f32 %v735_v18, %v343_v59  ;;  %v235_v5 = vpop.f32.mrb[7].mxu0  ;;  %v267_v6 = vpop.f32.mrb[7].mxu1  ;;  %v785_v7 = vadd.f32 %v735_v18, %v351_v62  ;;  %v344_v11 = vmul.f32 %v549_v1, %v730_v16 }
 0x102   :  { %598 = vpow2.f32 %v398_v54  ;;  %v788_v8 = vadd.f32 %v735_v18, %v341_v63  ;;  %v791_v9 = vadd.f32 %v735_v18, %v349_v0  ;;  %v352_v23 = vmul.f32 %v557_v2, %v730_v16 }
 0x103   :  { %600 = vpow2.f32 %v414_v57  ;;  %v382_v10 = vsub.f32 0.0, %v782_v4  ;;  %v390_v12 = vsub.f32 0.0, %v785_v7  ;;  %v799_v21 = vadd.f32 %v735_v18, %v344_v11 }
 0x104   :  { %602 = vpow2.f32 %v394_v58  ;;  %v380_v13 = vsub.f32 0.0, %v788_v8  ;;  %v388_v14 = vsub.f32 0.0, %v791_v9  ;;  %v342_v26 = vmul.f32 %v730_v16, %v235_v5 }
 0x105   :  { %604 = vpow2.f32 %v410_v3  ;;  %v404_v15 = vmul.f32 1.442695, %v382_v10  ;;  %v420_v17 = vmul.f32 1.442695, %v390_v12  ;;  %v350_v31 = vmul.f32 %v730_v16, %v267_v6 }
 0x106   :  { %v400_v19 = vmul.f32 1.442695, %v380_v13  ;;  %v416_v20 = vmul.f32 1.442695, %v388_v14  ;;  %v383_v36 = vsub.f32 0.0, %v799_v21  ;;  %v806_v39 = vadd.f32 %v735_v18, %v352_v23 }
 0x107   :  { %606 = vpow2.f32 %v404_v15  ;;  %v809_v46 = vadd.f32 %v735_v18, %v342_v26  ;;  %v812_v48 = vadd.f32 %v735_v18, %v350_v31 }
 0x108   :  { %v591_v22 = vpop.eup %590  ;;  %608 = vpow2.f32 %v420_v17  ;;  %v406_v51 = vmul.f32 1.442695, %v383_v36  ;;  %v391_v53 = vsub.f32 0.0, %v806_v39 }
 0x109   :  { %v593_v24 = vpop.eup %592  ;;  %v426_v25 = vadd.f32 1.0, %v591_v22  ;;  %610 = vpow2.f32 %v400_v19  ;;  %v381_v55 = vsub.f32 0.0, %v809_v46  ;;  %v389_v58 = vsub.f32 0.0, %v812_v48 }
 0x10a   :  { %v595_v27 = vpop.eup %594  ;;  %v434_v30 = vadd.f32 1.0, %v593_v24  ;;  %612 = vpow2.f32 %v416_v20  ;;  %v422_v62 = vmul.f32 1.442695, %v391_v53 }
 0x10b   :  { %v597_v32 = vpop.eup %596  ;;  %614 = vrcp.f32 %v426_v25  ;;  %v424_v33 = vadd.f32 1.0, %v595_v27  ;;  %v402_v1 = vmul.f32 1.442695, %v381_v55  ;;  %v418_v5 = vmul.f32 1.442695, %v389_v58 }
 0x10c   :  { %v599_v37 = vpop.eup %598  ;;  %616 = vrcp.f32 %v434_v30  ;;  %v432_v38 = vadd.f32 1.0, %v597_v32 }
 0x10d   :  { %v601_v42 = vpop.eup %600  ;;  %618 = vrcp.f32 %v424_v33  ;;  %v427_v43 = vadd.f32 1.0, %v599_v37 }
 0x10e   :  { %v603_v47 = vpop.eup %602  ;;  %620 = vrcp.f32 %v432_v38  ;;  %v435_v16 = vadd.f32 1.0, %v601_v42 }
 0x10f   :  { %v605_v49 = vpop.eup %604  ;;  %622 = vrcp.f32 %v427_v43  ;;  %v425_v50 = vadd.f32 1.0, %v603_v47 }
 0x110   :  { %624 = vrcp.f32 %v435_v16  ;;  %v433_v52 = vadd.f32 1.0, %v605_v49 }
 0x111   :  { %v607_v54 = vpop.eup %606  ;;  %626 = vrcp.f32 %v425_v50 }
 0x112   :  { %v609_v56 = vpop.eup %608  ;;  %628 = vrcp.f32 %v433_v52  ;;  %v430_v57 = vadd.f32 1.0, %v607_v54 }
 0x113   :  { %v611_v59 = vpop.eup %610  ;;  %v438_v18 = vadd.f32 1.0, %v609_v56  ;;  %630 = vpow2.f32 %v406_v51 }
 0x114   :  { %v613_v60 = vpop.eup %612  ;;  %632 = vrcp.f32 %v430_v57  ;;  %v428_v61 = vadd.f32 1.0, %v611_v59 }
 0x115   :  { %v615_v63 = vpop.eup %614  ;;  %634 = vrcp.f32 %v438_v18  ;;  %v436_v0 = vadd.f32 1.0, %v613_v60 }
 0x116   :  { %v617_v2 = vpop.eup %616  ;;  %v458_v3 = vmul.f32 %v615_v63, %v742_v28  ;;  %636 = vrcp.f32 %v428_v61 }
 0x117   :  { %v619_v6 = vpop.eup %618  ;;  %v466_v10 = vmul.f32 %v617_v2, %v745_v29  ;;  %638 = vrcp.f32 %v436_v0 }
 0x118   :  { %v621_v11 = vpop.eup %620  ;;  %474 = vst [vmem:[%s885_s4 + $0x10] sm:$0xff] %v458_v3  ;;  %v456_v12 = vmul.f32 %v619_v6, %v750_v34  ;;  %640 = vpow2.f32 %v422_v62 }
 0x119   :  { %v623_v13 = vpop.eup %622  ;;  %482 = vst [vmem:[%s885_s4 + $0x50] sm:$0xff] %v466_v10  ;;  %v464_v28 = vmul.f32 %v621_v11, %v753_v35  ;;  %642 = vpow2.f32 %v402_v1 }
 0x11a   :  { %v625_v14 = vpop.eup %624  ;;  %472 = vst [vmem:[%s885_s4] sm:$0xff] %v456_v12  ;;  %v459_v29 = vmul.f32 %v623_v13, %v760_v40  ;;  %644 = vpow2.f32 %v418_v5 }
 0x11b   :  { %v627_v15 = vpop.eup %626  ;;  %480 = vst [vmem:[%s885_s4 + $0x40] sm:$0xff] %v464_v28  ;;  %v467_v34 = vmul.f32 %v625_v14, %v763_v41 }
 0x11c   :  { %v629_v17 = vpop.eup %628  ;;  %475 = vst [vmem:[%s885_s4 + $0x18] sm:$0xff] %v459_v29  ;;  %v457_v35 = vmul.f32 %v627_v15, %v768_v44 }
 0x11d   :  { %v631_v19 = vpop.eup %630  ;;  %483 = vst [vmem:[%s885_s4 + $0x58] sm:$0xff] %v467_v34  ;;  %v465_v40 = vmul.f32 %v629_v17, %v771_v45 }
 0x11e   :  { %v633_v20 = vpop.eup %632  ;;  %473 = vst [vmem:[%s885_s4 + $0x8] sm:$0xff] %v457_v35  ;;  %v431_v41 = vadd.f32 1.0, %v631_v19 }
 0x11f   :  { %v635_v22 = vpop.eup %634  ;;  %481 = vst [vmem:[%s885_s4 + $0x48] sm:$0xff] %v465_v40  ;;  %v462_v44 = vmul.f32 %v633_v20, %v782_v4 }
 0x120   :  { %v637_v23 = vpop.eup %636  ;;  %v470_v24 = vmul.f32 %v635_v22, %v785_v7  ;;  %646 = vrcp.f32 %v431_v41 }
 0x121   :  { %v639_v25 = vpop.eup %638  ;;  %478 = vst [vmem:[%s885_s4 + $0x30] sm:$0xff] %v462_v44  ;;  %v460_v45 = vmul.f32 %v637_v23, %v788_v8 }
 0x122   :  { %v641_v26 = vpop.eup %640  ;;  %486 = vst [vmem:[%s885_s4 + $0x70] sm:$0xff] %v470_v24  ;;  %v468_v27 = vmul.f32 %v639_v25, %v791_v9 }
 0x123   :  { %v643_v30 = vpop.eup %642  ;;  %476 = vst [vmem:[%s885_s4 + $0x20] sm:$0xff] %v460_v45  ;;  %v439_v4 = vadd.f32 1.0, %v641_v26 }
 0x124   :  { %v645_v7 = vpop.eup %644  ;;  %484 = vst [vmem:[%s885_s4 + $0x60] sm:$0xff] %v468_v27  ;;  %v429_v31 = vadd.f32 1.0, %v643_v30 }
 0x125   :  { %648 = vrcp.f32 %v439_v4  ;;  %v437_v8 = vadd.f32 1.0, %v645_v7 }
 0x126   :  { %650 = vrcp.f32 %v429_v31 }
 0x127   :  { %652 = vrcp.f32 %v437_v8 }
 0x12a   :  { %v647_v32 = vpop.eup %646 }
 0x12b   :  { %v463_v33 = vmul.f32 %v647_v32, %v799_v21 }
 0x12d   :  { %479 = vst [vmem:[%s885_s4 + $0x38] sm:$0xff] %v463_v33 }
 0x12f   :  { %v649_v9 = vpop.eup %648 }
 0x130   :  { %v651_v36 = vpop.eup %650  ;;  %v471_v37 = vmul.f32 %v649_v9, %v806_v39 }
 0x131   :  { %v653_v38 = vpop.eup %652  ;;  %v461_v42 = vmul.f32 %v651_v36, %v809_v46 }
 0x132   :  { %487 = vst [vmem:[%s885_s4 + $0x78] sm:$0xff] %v471_v37  ;;  %v469_v43 = vmul.f32 %v653_v38, %v812_v48 }
 0x133   :  { %477 = vst [vmem:[%s885_s4 + $0x28] sm:$0xff] %v461_v42 }
 0x134   :  { %485 = vst [vmem:[%s885_s4 + $0x68] sm:$0xff] %v469_v43 }

// kernel: bigresblock_forward.15
= control target key start
LH: loop header
LB: loop body
LE: loop exit
PB: predicated region body
PF: predicated region fallthrough
CT: control target
= control target key end

     0   :  { %s1081_s1 = inlined_call_operand.vmem [shape: bf16[256,128], index: 1, kind: input, shape index: {}]   ;;  %s1082_s0 = inlined_call_operand.vmem [shape: bf16[128,256], index: 0, kind: input, shape index: {}]   ;;  %s1083_s2 = inlined_call_operand.vmem [shape: f32[1,128], index: 2, kind: input, shape index: {}]   ;;  %s1084_s3 = inlined_call_operand.vmem [shape: f32[1,128], index: 3, kind: input, shape index: {}]   ;;  %s1085_s4 = inlined_call_operand.vmem [shape: f32[128,128], index: 4, kind: output, shape index: {}]  }
   0x1   :  { %v702_v0 = vld [vmem:[%s1081_s1 + $0x40] sm:$0xff]   ;;  %v704_v2 = vld [vmem:[%s1081_s1 + $0x48] sm:$0xff]   ;;  %v706_v4 = vld [vmem:[%s1081_s1 + $0x50] sm:$0xff]  }
   0x2   :  { %v703_v1 = vld [vmem:[%s1081_s1] sm:$0xff]   ;;  %622 = vmatprep.subr.bf16.mxu0 %v702_v0  ;;  %686 = vmatprep.subr.bf16.mxu1 %v702_v0  ;;  %v705_v3 = vld [vmem:[%s1081_s1 + $0x8] sm:$0xff]   ;;  %v707_v5 = vld [vmem:[%s1081_s1 + $0x10] sm:$0xff]  }
   0x3   :  { %623 = vmatpush3.bf16.msra.mxu0 %v703_v1  ;;  %694 = vmatpush3.bf16.msra.mxu1 %v703_v1  ;;  %v708_v6 = vld [vmem:[%s1081_s1 + $0x58] sm:$0xff]   ;;  %v710_v8 = vld [vmem:[%s1081_s1 + $0x60] sm:$0xff]   ;;  %v712_v10 = vld [vmem:[%s1081_s1 + $0x68] sm:$0xff]  }
   0x4   :  { %624 = vmatprep.subr.bf16.mxu0 %v704_v2  ;;  %687 = vmatprep.subr.bf16.mxu1 %v704_v2  ;;  %v709_v7 = vld [vmem:[%s1081_s1 + $0x18] sm:$0xff]   ;;  %v711_v9 = vld [vmem:[%s1081_s1 + $0x20] sm:$0xff]   ;;  %v713_v13 = vld [vmem:[%s1081_s1 + $0x28] sm:$0xff]  }
   0x5   :  { %v720_v11 = vld [vmem:[%s1082_s0 + $0x4] ss:$8 sps:$4 sm:$0xff]   ;;  %v714_v14 = vld [vmem:[%s1081_s1 + $0x70] sm:$0xff]   ;;  %v716_v16 = vld [vmem:[%s1081_s1 + $0x78] sm:$0xff]  }
   0x6   :  { %v723_v12 = vld [vmem:[%s1082_s0 + $0x44] ss:$8 sps:$4 sm:$0xff]   ;;  %310 = vmatprep.mubr.bf16.mxu0 %v720_v11  ;;  %v715_v15 = vld [vmem:[%s1081_s1 + $0x30] sm:$0xff]   ;;  %v717_v17 = vld [vmem:[%s1081_s1 + $0x38] sm:$0xff]  }
   0x7   :  { %625 = vmatpush3.bf16.msra.mxu0 %v705_v3  ;;  %695 = vmatpush3.bf16.msra.mxu1 %v705_v3  ;;  %v718_v18 = vld [vmem:[%s1082_s0] ss:$8 sps:$4 sm:$0xff]   ;;  %v724_v20 = vld [vmem:[%s1082_s0 + $0x14] ss:$8 sps:$4 sm:$0xff]   ;;  %v728_v22 = vld [vmem:[%s1082_s0 + $0x10] ss:$8 sps:$4 sm:$0xff]  }
   0x8   :  { %626 = vmatprep.subr.bf16.mxu0 %v706_v4  ;;  %688 = vmatprep.subr.bf16.mxu1 %v706_v4  ;;  %v721_v19 = vld [vmem:[%s1082_s0 + $0x40] ss:$8 sps:$4 sm:$0xff]   ;;  %v726_v21 = vld [vmem:[%s1082_s0 + $0x54] ss:$8 sps:$4 sm:$0xff]   ;;  %v729_v23 = vld [vmem:[%s1082_s0 + $0x50] ss:$8 sps:$4 sm:$0xff]  }
   0x9   :  { %342 = vmatprep.mubr.bf16.mxu1 %v723_v12  ;;  %v730_v24 = vld [vmem:[%s1082_s0 + $0x24] ss:$8 sps:$4 sm:$0xff]   ;;  %v734_v26 = vld [vmem:[%s1082_s0 + $0x20] ss:$8 sps:$4 sm:$0xff]   ;;  %v736_v28 = vld [vmem:[%s1082_s0 + $0x34] ss:$8 sps:$4 sm:$0xff]  }
   0xa   :  { %v732_v25 = vld [vmem:[%s1082_s0 + $0x64] ss:$8 sps:$4 sm:$0xff]   ;;  %v735_v27 = vld [vmem:[%s1082_s0 + $0x60] ss:$8 sps:$4 sm:$0xff]   ;;  %v738_v29 = vld [vmem:[%s1082_s0 + $0x74] ss:$8 sps:$4 sm:$0xff]  }
   0xb   :  { %627 = vmatpush3.bf16.msra.mxu0 %v707_v5  ;;  %696 = vmatpush3.bf16.msra.mxu1 %v707_v5  ;;  %v740_v30 = vld [vmem:[%s1082_s0 + $0x30] ss:$8 sps:$4 sm:$0xff]   ;;  %v930_v35 = vld [vmem:[%s1083_s2] ss:$0 sm:$0xff] }
   0xc   :  { %628 = vmatprep.subr.bf16.mxu0 %v708_v6  ;;  %689 = vmatprep.subr.bf16.mxu1 %v708_v6  ;;  %v741_v31 = vld [vmem:[%s1082_s0 + $0x70] ss:$8 sps:$4 sm:$0xff]   ;;  %v935_v41 = vld [vmem:[%s1084_s3] ss:$0 sm:$0xff] }
   0xf   :  { %629 = vmatpush3.bf16.msra.mxu0 %v709_v7  ;;  %697 = vmatpush3.bf16.msra.mxu1 %v709_v7 }
  0x10   :  { %630 = vmatprep.subr.bf16.mxu0 %v710_v8  ;;  %690 = vmatprep.subr.bf16.mxu1 %v710_v8 }
  0x13   :  { %631 = vmatpush3.bf16.msra.mxu0 %v711_v9  ;;  %698 = vmatpush3.bf16.msra.mxu1 %v711_v9 }
  0x14   :  { %632 = vmatprep.subr.bf16.mxu0 %v712_v10  ;;  %691 = vmatprep.subr.bf16.mxu1 %v712_v10 }
  0x17   :  { %633 = vmatpush3.bf16.msra.mxu0 %v713_v13  ;;  %699 = vmatpush3.bf16.msra.mxu1 %v713_v13 }
  0x18   :  { %634 = vmatprep.subr.bf16.mxu0 %v714_v14  ;;  %692 = vmatprep.subr.bf16.mxu1 %v714_v14 }
  0x1b   :  { %635 = vmatpush3.bf16.msra.mxu0 %v715_v15  ;;  %700 = vmatpush3.bf16.msra.mxu1 %v715_v15 }
  0x1c   :  { %636 = vmatprep.subr.bf16.mxu0 %v716_v16  ;;  %693 = vmatprep.subr.bf16.mxu1 %v716_v16 }
  0x1f   :  { %637 = vmatpush3.bf16.msra.mxu0 %v717_v17  ;;  %701 = vmatpush3.bf16.msra.mxu1 %v717_v17 }
  0x22   :  { %311 = vmatmul.mubr.bf16.vlgmr.msra.gmra.mrb[0].mxu0 %v718_v18  ;;  %343 = vmatmul.mubr.bf16.vlgmr.msra.gmra.mrb[0].mxu1 %v721_v19 }
  0x23   :  { %318 = vmatprep.mubr.bf16.mxu0 %v724_v20  ;;  %350 = vmatprep.mubr.bf16.mxu1 %v726_v21 }
  0x2a   :  { %319 = vmatmul.mubr.bf16.gmra.mrb[4].mxu0 %v728_v22  ;;  %351 = vmatmul.mubr.bf16.gmra.mrb[4].mxu1 %v729_v23 }
  0x2b   :  { %326 = vmatprep.mubr.bf16.mxu0 %v730_v24  ;;  %358 = vmatprep.mubr.bf16.mxu1 %v732_v25 }
  0x32   :  { %327 = vmatmul.mubr.bf16.gmra.mrb[8].mxu0 %v734_v26  ;;  %359 = vmatmul.mubr.bf16.gmra.mrb[8].mxu1 %v735_v27 }
  0x33   :  { %334 = vmatprep.mubr.bf16.mxu0 %v736_v28  ;;  %366 = vmatprep.mubr.bf16.mxu1 %v738_v29 }
  0x3a   :  { %335 = vmatmul.mubr.bf16.gmra.mrb[12].mxu0 %v740_v30  ;;  %367 = vmatmul.mubr.bf16.gmra.mrb[12].mxu1 %v741_v31 }
  0xf5   :  { %v638_v32 = vpop.f32.mrb[0].mxu0  ;;  %v662_v33 = vpop.f32.mrb[0].mxu1 }
  0xf6   :  { %v639_v34 = vpop.f32.mrb[1].mxu0  ;;  %v663_v36 = vpop.f32.mrb[1].mxu1 }
  0xf7   :  { %v640_v37 = vadd.f32 %v639_v34, %v638_v32  ;;  %v664_v38 = vadd.f32 %v663_v36, %v662_v33  ;;  %v641_v39 = vpop.f32.mrb[2].mxu0  ;;  %v665_v40 = vpop.f32.mrb[2].mxu1 }
  0xf8   :  { %v642_v42 = vpop.f32.mrb[3].mxu0  ;;  %v666_v43 = vpop.f32.mrb[3].mxu1 }
  0xf9   :  { %v433_v44 = vmul.f32 %v640_v37, %v930_v35  ;;  %v441_v45 = vmul.f32 %v664_v38, %v930_v35  ;;  %v643_v46 = vadd.f32 %v642_v42, %v641_v39  ;;  %v667_v47 = vadd.f32 %v666_v43, %v665_v40 }
  0xfb   :  { %v940_v48 = vadd.f32 %v935_v41, %v433_v44  ;;  %v943_v49 = vadd.f32 %v935_v41, %v441_v45  ;;  %v434_v50 = vmul.f32 %v643_v46, %v930_v35  ;;  %v442_v51 = vmul.f32 %v667_v47, %v930_v35 }
  0xfd   :  { %v472_v52 = vsub.f32 0.0, %v940_v48  ;;  %v480_v53 = vsub.f32 0.0, %v943_v49  ;;  %v950_v54 = vadd.f32 %v935_v41, %v434_v50  ;;  %v953_v55 = vadd.f32 %v935_v41, %v442_v51  ;;  %v644_v56 = vpop.f32.mrb[4].mxu0  ;;  %v668_v57 = vpop.f32.mrb[4].mxu1 }
  0xfe   :  { %v645_v58 = vpop.f32.mrb[5].mxu0  ;;  %v669_v59 = vpop.f32.mrb[5].mxu1 }
  0xff   :  { %v488_v60 = vmul.f32 1.442695, %v472_v52  ;;  %v504_v61 = vmul.f32 1.442695, %v480_v53  ;;  %v473_v62 = vsub.f32 0.0, %v950_v54  ;;  %v481_v63 = vsub.f32 0.0, %v953_v55 }
 0x100   :  { %v646_v0 = vadd.f32 %v645_v58, %v644_v56  ;;  %v670_v1 = vadd.f32 %v669_v59, %v668_v57  ;;  %v647_v2 = vpop.f32.mrb[6].mxu0  ;;  %v671_v3 = vpop.f32.mrb[6].mxu1 }
 0x101   :  { %742 = vpow2.f32 %v488_v60  ;;  %v490_v4 = vmul.f32 1.442695, %v473_v62  ;;  %v506_v5 = vmul.f32 1.442695, %v481_v63  ;;  %v648_v6 = vpop.f32.mrb[7].mxu0  ;;  %v672_v7 = vpop.f32.mrb[7].mxu1 }
 0x102   :  { %744 = vpow2.f32 %v504_v61  ;;  %v435_v8 = vmul.f32 %v646_v0, %v930_v35  ;;  %v443_v9 = vmul.f32 %v670_v1, %v930_v35  ;;  %v649_v10 = vadd.f32 %v648_v6, %v647_v2 }
 0x103   :  { %746 = vpow2.f32 %v490_v4  ;;  %v673_v11 = vadd.f32 %v672_v7, %v671_v3 }
 0x104   :  { %748 = vpow2.f32 %v506_v5  ;;  %v960_v12 = vadd.f32 %v935_v41, %v435_v8  ;;  %v963_v13 = vadd.f32 %v935_v41, %v443_v9  ;;  %v436_v14 = vmul.f32 %v649_v10, %v930_v35 }
 0x105   :  { %v444_v15 = vmul.f32 %v673_v11, %v930_v35  ;;  %v650_v16 = vpop.f32.mrb[8].mxu0  ;;  %v674_v17 = vpop.f32.mrb[8].mxu1 }
 0x106   :  { %v474_v18 = vsub.f32 0.0, %v960_v12  ;;  %v482_v19 = vsub.f32 0.0, %v963_v13  ;;  %v970_v20 = vadd.f32 %v935_v41, %v436_v14  ;;  %v651_v21 = vpop.f32.mrb[9].mxu0  ;;  %v675_v22 = vpop.f32.mrb[9].mxu1 }
 0x107   :  { %v973_v23 = vadd.f32 %v935_v41, %v444_v15  ;;  %v652_v24 = vadd.f32 %v651_v21, %v650_v16  ;;  %v676_v25 = vadd.f32 %v675_v22, %v674_v17  ;;  %v653_v26 = vpop.f32.mrb[10].mxu0  ;;  %v677_v27 = vpop.f32.mrb[10].mxu1 }
 0x108   :  { %v492_v28 = vmul.f32 1.442695, %v474_v18  ;;  %v508_v29 = vmul.f32 1.442695, %v482_v19  ;;  %v475_v30 = vsub.f32 0.0, %v970_v20  ;;  %v654_v31 = vpop.f32.mrb[11].mxu0 }
 0x109   :  { %v483_v32 = vsub.f32 0.0, %v973_v23  ;;  %v437_v33 = vmul.f32 %v652_v24, %v930_v35  ;;  %v445_v34 = vmul.f32 %v676_v25, %v930_v35  ;;  %v655_v36 = vadd.f32 %v654_v31, %v653_v26  ;;  %v678_v37 = vpop.f32.mrb[11].mxu1 }
 0x10a   :  { %750 = vpow2.f32 %v492_v28  ;;  %v494_v38 = vmul.f32 1.442695, %v475_v30  ;;  %v679_v39 = vadd.f32 %v678_v37, %v677_v27 }
 0x10b   :  { %v743_v40 = vpop.eup %742  ;;  %752 = vpow2.f32 %v508_v29  ;;  %v510_v42 = vmul.f32 1.442695, %v483_v32  ;;  %v980_v43 = vadd.f32 %v935_v41, %v437_v33  ;;  %v983_v44 = vadd.f32 %v935_v41, %v445_v34 }
 0x10c   :  { %v745_v45 = vpop.eup %744  ;;  %v520_v46 = vadd.f32 1.0, %v743_v40  ;;  %754 = vpow2.f32 %v494_v38  ;;  %v438_v47 = vmul.f32 %v655_v36, %v930_v35  ;;  %v446_v50 = vmul.f32 %v679_v39, %v930_v35 }
 0x10d   :  { %v747_v51 = vpop.eup %746  ;;  %v528_v52 = vadd.f32 1.0, %v745_v45  ;;  %756 = vpow2.f32 %v510_v42  ;;  %v476_v53 = vsub.f32 0.0, %v980_v43  ;;  %v484_v56 = vsub.f32 0.0, %v983_v44  ;;  %v656_v57 = vpop.f32.mrb[12].mxu0 }
 0x10e   :  { %v680_v58 = vpop.f32.mrb[12].mxu1  ;;  %v749_v59 = vpop.eup %748  ;;  %758 = vrcp.f32 %v520_v46  ;;  %v521_v60 = vadd.f32 1.0, %v747_v51  ;;  %v990_v61 = vadd.f32 %v935_v41, %v438_v47  ;;  %v993_v62 = vadd.f32 %v935_v41, %v446_v50 }
 0x10f   :  { %v657_v63 = vpop.f32.mrb[13].mxu0  ;;  %v681_v0 = vpop.f32.mrb[13].mxu1  ;;  %760 = vrcp.f32 %v528_v52  ;;  %v529_v1 = vadd.f32 1.0, %v749_v59  ;;  %v496_v2 = vmul.f32 1.442695, %v476_v53 }
 0x110   :  { %v512_v3 = vmul.f32 1.442695, %v484_v56  ;;  %v659_v4 = vpop.f32.mrb[14].mxu0  ;;  %762 = vrcp.f32 %v521_v60  ;;  %v477_v5 = vsub.f32 0.0, %v990_v61  ;;  %v485_v6 = vsub.f32 0.0, %v993_v62  ;;  %v683_v8 = vpop.f32.mrb[14].mxu1 }
 0x111   :  { %v658_v7 = vadd.f32 %v657_v63, %v656_v57  ;;  %v660_v9 = vpop.f32.mrb[15].mxu0  ;;  %764 = vrcp.f32 %v529_v1  ;;  %v682_v10 = vadd.f32 %v681_v0, %v680_v58  ;;  %v684_v14 = vpop.f32.mrb[15].mxu1 }
 0x112   :  { %v661_v11 = vadd.f32 %v660_v9, %v659_v4  ;;  %766 = vpow2.f32 %v496_v2  ;;  %v498_v15 = vmul.f32 1.442695, %v477_v5  ;;  %v514_v16 = vmul.f32 1.442695, %v485_v6 }
 0x113   :  { %v439_v17 = vmul.f32 %v658_v7, %v930_v35  ;;  %768 = vpow2.f32 %v512_v3  ;;  %v447_v18 = vmul.f32 %v682_v10, %v930_v35  ;;  %v685_v21 = vadd.f32 %v684_v14, %v683_v8 }
 0x114   :  { %v440_v19 = vmul.f32 %v661_v11, %v930_v35  ;;  %v751_v22 = vpop.eup %750  ;;  %770 = vpow2.f32 %v498_v15 }
 0x115   :  { %v1001_v24 = vadd.f32 %v935_v41, %v439_v17  ;;  %v753_v25 = vpop.eup %752  ;;  %v522_v26 = vadd.f32 1.0, %v751_v22  ;;  %772 = vpow2.f32 %v514_v16  ;;  %v1004_v27 = vadd.f32 %v935_v41, %v447_v18 }
 0x116   :  { %v1007_v28 = vadd.f32 %v935_v41, %v440_v19  ;;  %v755_v29 = vpop.eup %754  ;;  %v530_v30 = vadd.f32 1.0, %v753_v25  ;;  %v448_v32 = vmul.f32 %v685_v21, %v930_v35 }
 0x117   :  { %v478_v31 = vsub.f32 0.0, %v1001_v24  ;;  %v757_v33 = vpop.eup %756  ;;  %774 = vrcp.f32 %v522_v26  ;;  %v523_v34 = vadd.f32 1.0, %v755_v29  ;;  %v486_v36 = vsub.f32 0.0, %v1004_v27 }
 0x118   :  { %v479_v37 = vsub.f32 0.0, %v1007_v28  ;;  %v759_v38 = vpop.eup %758  ;;  %776 = vrcp.f32 %v530_v30  ;;  %v531_v39 = vadd.f32 1.0, %v757_v33  ;;  %v1014_v42 = vadd.f32 %v935_v41, %v448_v32 }
 0x119   :  { %v500_v40 = vmul.f32 1.442695, %v478_v31  ;;  %v761_v45 = vpop.eup %760  ;;  %v552_v46 = vmul.f32 %v759_v38, %v940_v48  ;;  %778 = vrcp.f32 %v523_v34  ;;  %v516_v47 = vmul.f32 1.442695, %v486_v36 }
 0x11a   :  { %v502_v35 = vmul.f32 1.442695, %v479_v37  ;;  %v763_v50 = vpop.eup %762  ;;  %v560_v51 = vmul.f32 %v761_v45, %v943_v49  ;;  %780 = vrcp.f32 %v531_v39  ;;  %v487_v52 = vsub.f32 0.0, %v1014_v42 }
 0x11b   :  { %v765_v53 = vpop.eup %764  ;;  %568 = vst [vmem:[%s1085_s4] sm:$0xff] %v552_v46  ;;  %v553_v41 = vmul.f32 %v763_v50, %v950_v54  ;;  %782 = vpow2.f32 %v500_v40 }
 0x11c   :  { %v767_v56 = vpop.eup %766  ;;  %576 = vst [vmem:[%s1085_s4 + $0x40] sm:$0xff] %v560_v51  ;;  %v561_v48 = vmul.f32 %v765_v53, %v953_v55  ;;  %784 = vpow2.f32 %v516_v47  ;;  %v518_v49 = vmul.f32 1.442695, %v487_v52 }
 0x11d   :  { %v769_v57 = vpop.eup %768  ;;  %569 = vst [vmem:[%s1085_s4 + $0x8] sm:$0xff] %v553_v41  ;;  %v524_v58 = vadd.f32 1.0, %v767_v56  ;;  %786 = vpow2.f32 %v502_v35 }
 0x11e   :  { %v771_v59 = vpop.eup %770  ;;  %577 = vst [vmem:[%s1085_s4 + $0x48] sm:$0xff] %v561_v48  ;;  %v532_v54 = vadd.f32 1.0, %v769_v57  ;;  %788 = vpow2.f32 %v518_v49 }
 0x11f   :  { %v773_v60 = vpop.eup %772  ;;  %790 = vrcp.f32 %v524_v58  ;;  %v525_v63 = vadd.f32 1.0, %v771_v59 }
 0x120   :  { %792 = vrcp.f32 %v532_v54  ;;  %v533_v55 = vadd.f32 1.0, %v773_v60 }
 0x121   :  { %v775_v0 = vpop.eup %774  ;;  %794 = vrcp.f32 %v525_v63 }
 0x122   :  { %v777_v1 = vpop.eup %776  ;;  %v554_v2 = vmul.f32 %v775_v0, %v960_v12  ;;  %796 = vrcp.f32 %v533_v55 }
 0x123   :  { %v779_v3 = vpop.eup %778  ;;  %v562_v4 = vmul.f32 %v777_v1, %v963_v13 }
 0x124   :  { %v781_v5 = vpop.eup %780  ;;  %570 = vst [vmem:[%s1085_s4 + $0x10] sm:$0xff] %v554_v2  ;;  %v555_v6 = vmul.f32 %v779_v3, %v970_v20 }
 0x125   :  { %v783_v7 = vpop.eup %782  ;;  %578 = vst [vmem:[%s1085_s4 + $0x50] sm:$0xff] %v562_v4  ;;  %v563_v8 = vmul.f32 %v781_v5, %v973_v23 }
 0x126   :  { %v785_v9 = vpop.eup %784  ;;  %571 = vst [vmem:[%s1085_s4 + $0x18] sm:$0xff] %v555_v6  ;;  %v526_v12 = vadd.f32 1.0, %v783_v7 }
 0x127   :  { %v787_v13 = vpop.eup %786  ;;  %579 = vst [vmem:[%s1085_s4 + $0x58] sm:$0xff] %v563_v8  ;;  %v534_v10 = vadd.f32 1.0, %v785_v9 }
 0x128   :  { %v789_v20 = vpop.eup %788  ;;  %798 = vrcp.f32 %v526_v12  ;;  %v527_v11 = vadd.f32 1.0, %v787_v13 }
 0x129   :  { %v791_v14 = vpop.eup %790  ;;  %800 = vrcp.f32 %v534_v10  ;;  %v535_v15 = vadd.f32 1.0, %v789_v20 }
 0x12a   :  { %v793_v16 = vpop.eup %792  ;;  %v556_v23 = vmul.f32 %v791_v14, %v980_v43  ;;  %802 = vrcp.f32 %v527_v11 }
 0x12b   :  { %v795_v17 = vpop.eup %794  ;;  %v564_v18 = vmul.f32 %v793_v16, %v983_v44  ;;  %804 = vrcp.f32 %v535_v15 }
 0x12c   :  { %v797_v19 = vpop.eup %796  ;;  %572 = vst [vmem:[%s1085_s4 + $0x20] sm:$0xff] %v556_v23  ;;  %v557_v21 = vmul.f32 %v795_v17, %v990_v61 }
 0x12d   :  { %580 = vst [vmem:[%s1085_s4 + $0x60] sm:$0xff] %v564_v18  ;;  %v565_v22 = vmul.f32 %v797_v19, %v993_v62 }
 0x12e   :  { %573 = vst [vmem:[%s1085_s4 + $0x28] sm:$0xff] %v557_v21 }
 0x12f   :  { %581 = vst [vmem:[%s1085_s4 + $0x68] sm:$0xff] %v565_v22 }
 0x132   :  { %v799_v43 = vpop.eup %798 }
 0x133   :  { %v801_v44 = vpop.eup %800  ;;  %v558_v25 = vmul.f32 %v799_v43, %v1001_v24 }
 0x134   :  { %v803_v26 = vpop.eup %802  ;;  %v566_v61 = vmul.f32 %v801_v44, %v1004_v27 }
 0x135   :  { %v805_v29 = vpop.eup %804  ;;  %574 = vst [vmem:[%s1085_s4 + $0x30] sm:$0xff] %v558_v25  ;;  %v559_v62 = vmul.f32 %v803_v26, %v1007_v28 }
 0x136   :  { %582 = vst [vmem:[%s1085_s4 + $0x70] sm:$0xff] %v566_v61  ;;  %v567_v30 = vmul.f32 %v805_v29, %v1014_v42 }
 0x137   :  { %575 = vst [vmem:[%s1085_s4 + $0x38] sm:$0xff] %v559_v62 }
 0x138   :  { %583 = vst [vmem:[%s1085_s4 + $0x78] sm:$0xff] %v567_v30 }

// kernel: bigresblock_forward.8
= control target key start
LH: loop header
LB: loop body
LE: loop exit
PB: predicated region body
PF: predicated region fallthrough
CT: control target
= control target key end

     0   :  { %s3183_s1 = inlined_call_operand.vmem [shape: bf16[1152,128], index: 1, kind: input, shape index: {}]   ;;  %s3184_s0 = inlined_call_operand.vmem [shape: bf16[128,1152], index: 0, kind: input, shape index: {}]   ;;  %s3185_s2 = inlined_call_operand.vmem [shape: f32[1,128], index: 2, kind: input, shape index: {}]   ;;  %s3186_s3 = inlined_call_operand.vmem [shape: f32[1,128], index: 3, kind: input, shape index: {}]   ;;  %s3187_s4 = inlined_call_operand.vmem [shape: f32[128,128], index: 4, kind: output, shape index: {}]  }
   0x1   :  { %v2242_v0 = vld [vmem:[%s3183_s1 + $0x40] sm:$0xff]   ;;  %v2246_v4 = vld [vmem:[%s3183_s1 + $0x48] sm:$0xff]   ;;  %v2250_v8 = vld [vmem:[%s3183_s1 + $0x50] sm:$0xff]  }
   0x2   :  { %v2243_v1 = vld [vmem:[%s3183_s1 + $0xc0] sm:$0xff]   ;;  %1922 = vmatprep.subr.bf16.mxu0 %v2242_v0  ;;  %v2247_v5 = vld [vmem:[%s3183_s1 + $0xc8] sm:$0xff]   ;;  %v2251_v9 = vld [vmem:[%s3183_s1 + $0xd0] sm:$0xff]  }
   0x3   :  { %v2244_v2 = vld [vmem:[%s3183_s1] sm:$0xff]   ;;  %1986 = vmatprep.subr.bf16.mxu1 %v2243_v1  ;;  %v2248_v6 = vld [vmem:[%s3183_s1 + $0x8] sm:$0xff]   ;;  %v2252_v10 = vld [vmem:[%s3183_s1 + $0x10] sm:$0xff]  }
   0x4   :  { %v2245_v3 = vld [vmem:[%s3183_s1 + $0x80] sm:$0xff]   ;;  %1923 = vmatpush3.bf16.msra.mxu0 %v2244_v2  ;;  %v2249_v7 = vld [vmem:[%s3183_s1 + $0x88] sm:$0xff]   ;;  %v2253_v11 = vld [vmem:[%s3183_s1 + $0x90] sm:$0xff]  }
   0x5   :  { %1987 = vmatpush3.bf16.msra.mxu1 %v2245_v3  ;;  %1924 = vmatprep.subr.bf16.mxu0 %v2246_v4  ;;  %v2254_v12 = vld [vmem:[%s3183_s1 + $0x58] sm:$0xff]   ;;  %v2258_v16 = vld [vmem:[%s3183_s1 + $0x60] sm:$0xff]   ;;  %v2262_v20 = vld [vmem:[%s3183_s1 + $0x68] sm:$0xff]  }
   0x6   :  { %1988 = vmatprep.subr.bf16.mxu1 %v2247_v5  ;;  %v2255_v13 = vld [vmem:[%s3183_s1 + $0xd8] sm:$0xff]   ;;  %v2259_v17 = vld [vmem:[%s3183_s1 + $0xe0] sm:$0xff]   ;;  %v2263_v21 = vld [vmem:[%s3183_s1 + $0xe8] sm:$0xff]  }
   0x7   :  { %v2256_v14 = vld [vmem:[%s3183_s1 + $0x18] sm:$0xff]   ;;  %v2260_v18 = vld [vmem:[%s3183_s1 + $0x20] sm:$0xff]   ;;  %v2264_v22 = vld [vmem:[%s3183_s1 + $0x28] sm:$0xff]  }
   0x8   :  { %1925 = vmatpush3.bf16.msra.mxu0 %v2248_v6  ;;  %v2257_v15 = vld [vmem:[%s3183_s1 + $0x98] sm:$0xff]   ;;  %v2261_v19 = vld [vmem:[%s3183_s1 + $0xa0] sm:$0xff]   ;;  %v2265_v23 = vld [vmem:[%s3183_s1 + $0xa8] sm:$0xff]  }
   0x9   :  { %1989 = vmatpush3.bf16.msra.mxu1 %v2249_v7  ;;  %1926 = vmatprep.subr.bf16.mxu0 %v2250_v8  ;;  %v2266_v24 = vld [vmem:[%s3183_s1 + $0x70] sm:$0xff]   ;;  %v2270_v28 = vld [vmem:[%s3183_s1 + $0x78] sm:$0xff]   ;;  %v2274_v32 = vld [vmem:[%s3184_s0] ss:$36 sps:$4 sm:$0xff]  }
   0xa   :  { %1990 = vmatprep.subr.bf16.mxu1 %v2251_v9  ;;  %v2267_v25 = vld [vmem:[%s3183_s1 + $0xf0] sm:$0xff]   ;;  %v2271_v29 = vld [vmem:[%s3183_s1 + $0xf8] sm:$0xff]   ;;  %v2276_v33 = vld [vmem:[%s3184_s0 + $0x4] ss:$36 sps:$4 sm:$0xff]  }
   0xb   :  { %v2268_v26 = vld [vmem:[%s3183_s1 + $0x30] sm:$0xff]   ;;  %v2272_v30 = vld [vmem:[%s3183_s1 + $0x38] sm:$0xff]   ;;  %v2277_v34 = vld [vmem:[%s3184_s0 + $0x8] ss:$36 sps:$4 sm:$0xff]   ;;  %1110 = vmatprep.mubr.bf16.mxu0 %v2276_v33 }
   0xc   :  { %1927 = vmatpush3.bf16.msra.mxu0 %v2252_v10  ;;  %v2269_v27 = vld [vmem:[%s3183_s1 + $0xb0] sm:$0xff]   ;;  %v2273_v31 = vld [vmem:[%s3183_s1 + $0xb8] sm:$0xff]   ;;  %v2280_v36 = vld [vmem:[%s3183_s1 + $0x140] sm:$0xff]  }
   0xd   :  { %1991 = vmatpush3.bf16.msra.mxu1 %v2253_v11  ;;  %1928 = vmatprep.subr.bf16.mxu0 %v2254_v12  ;;  %v2279_v35 = vld [vmem:[%s3184_s0 + $0xc] ss:$36 sps:$4 sm:$0xff]   ;;  %v2281_v37 = vld [vmem:[%s3183_s1 + $0x1c0] sm:$0xff]   ;;  %v2286_v41 = vld [vmem:[%s3184_s0 + $0x54] ss:$36 sps:$4 sm:$0xff]  }
   0xe   :  { %1992 = vmatprep.subr.bf16.mxu1 %v2255_v13  ;;  %1207 = vmatprep.mubr.bf16.mxu1 %v2279_v35  ;;  %v2282_v38 = vld [vmem:[%s3183_s1 + $0x100] sm:$0xff]   ;;  %v2284_v40 = vld [vmem:[%s3184_s0 + $0x4c] ss:$36 sps:$4 sm:$0xff]   ;;  %v2294_v48 = vld [vmem:[%s3184_s0 + $0x94] ss:$36 sps:$4 sm:$0xff]  }
   0xf   :  { %v2283_v39 = vld [vmem:[%s3183_s1 + $0x180] sm:$0xff]   ;;  %v2288_v42 = vld [vmem:[%s3184_s0 + $0x48] ss:$36 sps:$4 sm:$0xff]   ;;  %v2289_v43 = vld [vmem:[%s3184_s0 + $0x50] ss:$36 sps:$4 sm:$0xff]  }
  0x10   :  { %1929 = vmatpush3.bf16.msra.mxu0 %v2256_v14  ;;  %v2290_v44 = vld [vmem:[%s3183_s1 + $0x148] sm:$0xff]   ;;  %v2296_v49 = vld [vmem:[%s3184_s0 + $0x9c] ss:$36 sps:$4 sm:$0xff]   ;;  %v2298_v50 = vld [vmem:[%s3184_s0 + $0x90] ss:$36 sps:$4 sm:$0xff]  }
  0x11   :  { %1993 = vmatpush3.bf16.msra.mxu1 %v2257_v15  ;;  %1930 = vmatprep.subr.bf16.mxu0 %v2258_v16  ;;  %v2291_v45 = vld [vmem:[%s3183_s1 + $0x1c8] sm:$0xff]   ;;  %v2299_v51 = vld [vmem:[%s3184_s0 + $0x98] ss:$36 sps:$4 sm:$0xff]   ;;  %v2300_v52 = vld [vmem:[%s3183_s1 + $0x150] sm:$0xff]  }
  0x12   :  { %1994 = vmatprep.subr.bf16.mxu1 %v2259_v17  ;;  %v2292_v46 = vld [vmem:[%s3183_s1 + $0x108] sm:$0xff]   ;;  %v2301_v53 = vld [vmem:[%s3183_s1 + $0x1d0] sm:$0xff]   ;;  %v2304_v56 = vld [vmem:[%s3184_s0 + $0xdc] ss:$36 sps:$4 sm:$0xff]  }
  0x13   :  { %v2293_v47 = vld [vmem:[%s3183_s1 + $0x188] sm:$0xff]   ;;  %v2302_v54 = vld [vmem:[%s3183_s1 + $0x110] sm:$0xff]   ;;  %v2308_v58 = vld [vmem:[%s3184_s0 + $0xd8] ss:$36 sps:$4 sm:$0xff]  }
  0x14   :  { %1931 = vmatpush3.bf16.msra.mxu0 %v2260_v18  ;;  %v2303_v55 = vld [vmem:[%s3183_s1 + $0x190] sm:$0xff]   ;;  %v2306_v57 = vld [vmem:[%s3184_s0 + $0xe4] ss:$36 sps:$4 sm:$0xff]   ;;  %v2310_v60 = vld [vmem:[%s3183_s1 + $0x158] sm:$0xff]  }
  0x15   :  { %1995 = vmatpush3.bf16.msra.mxu1 %v2261_v19  ;;  %1932 = vmatprep.subr.bf16.mxu0 %v2262_v20  ;;  %v2309_v59 = vld [vmem:[%s3184_s0 + $0xe0] ss:$36 sps:$4 sm:$0xff]   ;;  %v2311_v61 = vld [vmem:[%s3183_s1 + $0x1d8] sm:$0xff]   ;;  %v2316_v1 = vld [vmem:[%s3184_s0 + $0x12c] ss:$36 sps:$4 sm:$0xff]  }
  0x16   :  { %1996 = vmatprep.subr.bf16.mxu1 %v2263_v21  ;;  %v2312_v62 = vld [vmem:[%s3183_s1 + $0x118] sm:$0xff]   ;;  %v2314_v0 = vld [vmem:[%s3184_s0 + $0x124] ss:$36 sps:$4 sm:$0xff]   ;;  %v2324_v8 = vld [vmem:[%s3184_s0 + $0x16c] ss:$36 sps:$4 sm:$0xff]  }
  0x17   :  { %v2313_v63 = vld [vmem:[%s3183_s1 + $0x198] sm:$0xff]   ;;  %v2318_v2 = vld [vmem:[%s3184_s0 + $0x120] ss:$36 sps:$4 sm:$0xff]   ;;  %v2319_v4 = vld [vmem:[%s3184_s0 + $0x128] ss:$36 sps:$4 sm:$0xff]  }
  0x18   :  { %1933 = vmatpush3.bf16.msra.mxu0 %v2264_v22  ;;  %v2320_v3 = vld [vmem:[%s3183_s1 + $0x160] sm:$0xff]   ;;  %v2326_v9 = vld [vmem:[%s3184_s0 + $0x174] ss:$36 sps:$4 sm:$0xff]   ;;  %v2330_v10 = vld [vmem:[%s3183_s1 + $0x168] sm:$0xff]  }
  0x19   :  { %1997 = vmatpush3.bf16.msra.mxu1 %v2265_v23  ;;  %1934 = vmatprep.subr.bf16.mxu0 %v2266_v24  ;;  %v2321_v5 = vld [vmem:[%s3183_s1 + $0x1e0] sm:$0xff]   ;;  %v2331_v11 = vld [vmem:[%s3183_s1 + $0x1e8] sm:$0xff]   ;;  %v2329_v15 = vld [vmem:[%s3184_s0 + $0x170] ss:$36 sps:$4 sm:$0xff]  }
  0x1a   :  { %1998 = vmatprep.subr.bf16.mxu1 %v2267_v25  ;;  %v2322_v6 = vld [vmem:[%s3183_s1 + $0x120] sm:$0xff]   ;;  %v2328_v12 = vld [vmem:[%s3184_s0 + $0x168] ss:$36 sps:$4 sm:$0xff]   ;;  %v2334_v16 = vld [vmem:[%s3184_s0 + $0x1b4] ss:$36 sps:$4 sm:$0xff]  }
  0x1b   :  { %v2323_v7 = vld [vmem:[%s3183_s1 + $0x1a0] sm:$0xff]   ;;  %v2332_v13 = vld [vmem:[%s3183_s1 + $0x128] sm:$0xff]   ;;  %v2340_v18 = vld [vmem:[%s3183_s1 + $0x170] sm:$0xff]  }
  0x1c   :  { %1935 = vmatpush3.bf16.msra.mxu0 %v2268_v26  ;;  %v2333_v14 = vld [vmem:[%s3183_s1 + $0x1a8] sm:$0xff]   ;;  %v2336_v17 = vld [vmem:[%s3184_s0 + $0x1bc] ss:$36 sps:$4 sm:$0xff]   ;;  %v2341_v19 = vld [vmem:[%s3183_s1 + $0x1f0] sm:$0xff]  }
  0x1d   :  { %1999 = vmatpush3.bf16.msra.mxu1 %v2269_v27  ;;  %1936 = vmatprep.subr.bf16.mxu0 %v2270_v28  ;;  %v2342_v20 = vld [vmem:[%s3183_s1 + $0x130] sm:$0xff]   ;;  %v2339_v23 = vld [vmem:[%s3184_s0 + $0x1b8] ss:$36 sps:$4 sm:$0xff]   ;;  %v2346_v25 = vld [vmem:[%s3184_s0 + $0x204] ss:$36 sps:$4 sm:$0xff]  }
  0x1e   :  { %2000 = vmatprep.subr.bf16.mxu1 %v2271_v29  ;;  %v2343_v21 = vld [vmem:[%s3183_s1 + $0x1b0] sm:$0xff]   ;;  %v2344_v24 = vld [vmem:[%s3184_s0 + $0x1fc] ss:$36 sps:$4 sm:$0xff]  }
  0x1f   :  { %v2338_v22 = vld [vmem:[%s3184_s0 + $0x1b0] ss:$36 sps:$4 sm:$0xff]   ;;  %v2350_v26 = vld [vmem:[%s3183_s1 + $0x178] sm:$0xff]  }
  0x20   :  { %1937 = vmatpush3.bf16.msra.mxu0 %v2272_v30  ;;  %v2351_v27 = vld [vmem:[%s3183_s1 + $0x1f8] sm:$0xff]   ;;  %v2354_v35 = vld [vmem:[%s3184_s0 + $0x10] ss:$36 sps:$4 sm:$0xff]  }
  0x21   :  { %2001 = vmatpush3.bf16.msra.mxu1 %v2273_v31  ;;  %2050 = vmatprep.subr.bf16.mxu0 %v2280_v36  ;;  %v2352_v28 = vld [vmem:[%s3183_s1 + $0x138] sm:$0xff]   ;;  %v2349_v31 = vld [vmem:[%s3184_s0 + $0x200] ss:$36 sps:$4 sm:$0xff]  }
  0x22   :  { %2114 = vmatprep.subr.bf16.mxu1 %v2281_v37  ;;  %v2353_v29 = vld [vmem:[%s3183_s1 + $0x1b8] sm:$0xff]  }
  0x23   :  { %1111 = vmatmul.mubr.bf16.vlgmr.msra.gmra.mrb[0].mxu0 %v2274_v32  ;;  %v2348_v30 = vld [vmem:[%s3184_s0 + $0x1f8] ss:$36 sps:$4 sm:$0xff]   ;;  %v2360_v32 = vld [vmem:[%s3183_s1 + $0x200] sm:$0xff]  }
  0x24   :  { %1208 = vmatmul.mubr.bf16.vlgmr.msra.gmra.mrb[0].mxu1 %v2277_v34  ;;  %2051 = vmatpush3.bf16.msra.mxu0 %v2282_v38  ;;  %v2356_v33 = vld [vmem:[%s3184_s0 + $0x14] ss:$36 sps:$4 sm:$0xff]   ;;  %v2359_v34 = vld [vmem:[%s3184_s0 + $0x1c] ss:$36 sps:$4 sm:$0xff]   ;;  %v2363_v38 = vld [vmem:[%s3184_s0 + $0x64] ss:$36 sps:$4 sm:$0xff]  }
  0x25   :  { %2115 = vmatpush3.bf16.msra.mxu1 %v2283_v39  ;;  %1118 = vmatprep.mubr.bf16.mxu0 %v2284_v40  ;;  %v2357_v36 = vld [vmem:[%s3184_s0 + $0x18] ss:$36 sps:$4 sm:$0xff]   ;;  %v2367_v39 = vld [vmem:[%s3183_s1 + $0x208] sm:$0xff]   ;;  %v2374_v40 = vld [vmem:[%s3183_s1 + $0x210] sm:$0xff]  }
  0x26   :  { %1215 = vmatprep.mubr.bf16.mxu1 %v2286_v41  ;;  %2052 = vmatprep.subr.bf16.mxu0 %v2290_v44  ;;  %v2361_v37 = vld [vmem:[%s3184_s0 + $0x5c] ss:$36 sps:$4 sm:$0xff]   ;;  %v2370_v44 = vld [vmem:[%s3184_s0 + $0xac] ss:$36 sps:$4 sm:$0xff]  }
  0x27   :  { %2116 = vmatprep.subr.bf16.mxu1 %v2291_v45  ;;  %v2365_v41 = vld [vmem:[%s3184_s0 + $0x58] ss:$36 sps:$4 sm:$0xff]  }
  0x28   :  { %2053 = vmatpush3.bf16.msra.mxu0 %v2292_v46  ;;  %v2381_v45 = vld [vmem:[%s3183_s1 + $0x218] sm:$0xff]   ;;  %v2388_v46 = vld [vmem:[%s3183_s1 + $0x220] sm:$0xff]  }
  0x29   :  { %2117 = vmatpush3.bf16.msra.mxu1 %v2293_v47  ;;  %2054 = vmatprep.subr.bf16.mxu0 %v2300_v52  ;;  %v2372_v47 = vld [vmem:[%s3184_s0 + $0xa0] ss:$36 sps:$4 sm:$0xff]   ;;  %v2379_v52 = vld [vmem:[%s3184_s0 + $0xe8] ss:$36 sps:$4 sm:$0xff]  }
  0x2a   :  { %2118 = vmatprep.subr.bf16.mxu1 %v2301_v53  ;;  %v2402_v53 = vld [vmem:[%s3183_s1 + $0x230] sm:$0xff]  }
  0x2b   :  { %1119 = vmatmul.mubr.bf16.gmra.mrb[4].mxu0 %v2288_v42  ;;  %v2366_v42 = vld [vmem:[%s3184_s0 + $0x60] ss:$36 sps:$4 sm:$0xff]  }
  0x2c   :  { %1216 = vmatmul.mubr.bf16.gmra.mrb[4].mxu1 %v2289_v43  ;;  %1126 = vmatprep.mubr.bf16.mxu0 %v2294_v48  ;;  %v2368_v43 = vld [vmem:[%s3184_s0 + $0xa4] ss:$36 sps:$4 sm:$0xff]  }
  0x2d   :  { %1223 = vmatprep.mubr.bf16.mxu1 %v2296_v49  ;;  %2055 = vmatpush3.bf16.msra.mxu0 %v2302_v54  ;;  %v2373_v48 = vld [vmem:[%s3184_s0 + $0xa8] ss:$36 sps:$4 sm:$0xff]   ;;  %v2380_v54 = vld [vmem:[%s3184_s0 + $0xf0] ss:$36 sps:$4 sm:$0xff]  }
  0x2e   :  { %2119 = vmatpush3.bf16.msra.mxu1 %v2303_v55  ;;  %2056 = vmatprep.subr.bf16.mxu0 %v2310_v60  ;;  %v2375_v49 = vld [vmem:[%s3184_s0 + $0xec] ss:$36 sps:$4 sm:$0xff]   ;;  %v2382_v55 = vld [vmem:[%s3184_s0 + $0x134] ss:$36 sps:$4 sm:$0xff]   ;;  %v2389_v60 = vld [vmem:[%s3184_s0 + $0x17c] ss:$36 sps:$4 sm:$0xff]  }
  0x2f   :  { %2120 = vmatprep.subr.bf16.mxu1 %v2311_v61  ;;  %v2391_v61 = vld [vmem:[%s3184_s0 + $0x184] ss:$36 sps:$4 sm:$0xff]  }
  0x31   :  { %2057 = vmatpush3.bf16.msra.mxu0 %v2312_v62  ;;  %v2393_v62 = vld [vmem:[%s3184_s0 + $0x178] ss:$36 sps:$4 sm:$0xff]  }
  0x32   :  { %2121 = vmatpush3.bf16.msra.mxu1 %v2313_v63  ;;  %2058 = vmatprep.subr.bf16.mxu0 %v2320_v3  ;;  %v2394_v63 = vld [vmem:[%s3184_s0 + $0x180] ss:$36 sps:$4 sm:$0xff]   ;;  %v2401_v3 = vld [vmem:[%s3184_s0 + $0x1c8] ss:$36 sps:$4 sm:$0xff]  }
  0x33   :  { %1127 = vmatmul.mubr.bf16.gmra.mrb[8].mxu0 %v2298_v50  ;;  %2122 = vmatprep.subr.bf16.mxu1 %v2321_v5  ;;  %v2377_v50 = vld [vmem:[%s3184_s0 + $0xf4] ss:$36 sps:$4 sm:$0xff]  }
  0x34   :  { %1224 = vmatmul.mubr.bf16.gmra.mrb[8].mxu1 %v2299_v51  ;;  %1134 = vmatprep.mubr.bf16.mxu0 %v2304_v56  ;;  %v2395_v51 = vld [vmem:[%s3183_s1 + $0x228] sm:$0xff]   ;;  %v2384_v56 = vld [vmem:[%s3184_s0 + $0x13c] ss:$36 sps:$4 sm:$0xff]   ;;  %v2405_v5 = vld [vmem:[%s3184_s0 + $0x214] ss:$36 sps:$4 sm:$0xff]  }
  0x35   :  { %1231 = vmatprep.mubr.bf16.mxu1 %v2306_v57  ;;  %2059 = vmatpush3.bf16.msra.mxu0 %v2322_v6  ;;  %v2409_v57 = vld [vmem:[%s3183_s1 + $0x238] sm:$0xff]   ;;  %v2407_v6 = vld [vmem:[%s3184_s0 + $0x208] ss:$36 sps:$4 sm:$0xff]  }
  0x36   :  { %2123 = vmatpush3.bf16.msra.mxu1 %v2323_v7  ;;  %2060 = vmatprep.subr.bf16.mxu0 %v2330_v10  ;;  %v2408_v7 = vld [vmem:[%s3184_s0 + $0x210] ss:$36 sps:$4 sm:$0xff]   ;;  %v2412_v10 = vld [vmem:[%s3184_s0 + $0x68] ss:$36 sps:$4 sm:$0xff]  }
  0x37   :  { %2124 = vmatprep.subr.bf16.mxu1 %v2331_v11  ;;  %v2413_v11 = vld [vmem:[%s3184_s0 + $0x188] ss:$36 sps:$4 sm:$0xff]  }
  0x39   :  { %2061 = vmatpush3.bf16.msra.mxu0 %v2332_v13  ;;  %v2415_v13 = vld [vmem:[%s3184_s0 + $0x1d0] ss:$36 sps:$4 sm:$0xff]  }
  0x3a   :  { %2125 = vmatpush3.bf16.msra.mxu1 %v2333_v14  ;;  %2062 = vmatprep.subr.bf16.mxu0 %v2340_v18  ;;  %v2416_v14 = vld [vmem:[%s3184_s0 + $0xf8] ss:$36 sps:$4 sm:$0xff]  }
  0x3b   :  { %1135 = vmatmul.mubr.bf16.gmra.mrb[12].mxu0 %v2308_v58  ;;  %2126 = vmatprep.subr.bf16.mxu1 %v2341_v19  ;;  %v2386_v58 = vld [vmem:[%s3184_s0 + $0x130] ss:$36 sps:$4 sm:$0xff]  }
  0x3c   :  { %1232 = vmatmul.mubr.bf16.gmra.mrb[12].mxu1 %v2309_v59  ;;  %1142 = vmatprep.mubr.bf16.mxu0 %v2314_v0  ;;  %v2387_v59 = vld [vmem:[%s3184_s0 + $0x138] ss:$36 sps:$4 sm:$0xff]   ;;  %v2396_v0 = vld [vmem:[%s3184_s0 + $0x1c4] ss:$36 sps:$4 sm:$0xff]  }
  0x3d   :  { %1239 = vmatprep.mubr.bf16.mxu1 %v2316_v1  ;;  %2063 = vmatpush3.bf16.msra.mxu0 %v2342_v20  ;;  %v2398_v1 = vld [vmem:[%s3184_s0 + $0x1cc] ss:$36 sps:$4 sm:$0xff]  }
  0x3e   :  { %2127 = vmatpush3.bf16.msra.mxu1 %v2343_v21  ;;  %2064 = vmatprep.subr.bf16.mxu0 %v2350_v26 }
  0x3f   :  { %2128 = vmatprep.subr.bf16.mxu1 %v2351_v27 }
  0x41   :  { %2065 = vmatpush3.bf16.msra.mxu0 %v2352_v28 }
  0x42   :  { %2129 = vmatpush3.bf16.msra.mxu1 %v2353_v29  ;;  %2194 = vmatprep.subr.bf16.mxu0 %v2360_v32 }
  0x43   :  { %1143 = vmatmul.mubr.bf16.gmra.mrb[16].mxu0 %v2318_v2  ;;  %2226 = vmatprep.subr.bf16.mxu1 %v2360_v32  ;;  %v2400_v2 = vld [vmem:[%s3184_s0 + $0x1c0] ss:$36 sps:$4 sm:$0xff]  }
  0x44   :  { %1240 = vmatmul.mubr.bf16.gmra.mrb[16].mxu1 %v2319_v4  ;;  %1150 = vmatprep.mubr.bf16.mxu0 %v2324_v8  ;;  %v2403_v4 = vld [vmem:[%s3184_s0 + $0x20c] ss:$36 sps:$4 sm:$0xff]   ;;  %v2410_v8 = vld [vmem:[%s3184_s0 + $0x20] ss:$36 sps:$4 sm:$0xff]  }
  0x45   :  { %1247 = vmatprep.mubr.bf16.mxu1 %v2326_v9  ;;  %v2411_v9 = vld [vmem:[%s3184_s0 + $0x140] ss:$36 sps:$4 sm:$0xff]  }
  0x4b   :  { %1151 = vmatmul.mubr.bf16.gmra.mrb[20].mxu0 %v2328_v12  ;;  %v2414_v12 = vld [vmem:[%s3184_s0 + $0xb0] ss:$36 sps:$4 sm:$0xff]  }
  0x4c   :  { %1248 = vmatmul.mubr.bf16.gmra.mrb[20].mxu1 %v2329_v15  ;;  %1158 = vmatprep.mubr.bf16.mxu0 %v2334_v16  ;;  %v2417_v15 = vld [vmem:[%s3184_s0 + $0x218] ss:$36 sps:$4 sm:$0xff]  }
  0x4d   :  { %1255 = vmatprep.mubr.bf16.mxu1 %v2336_v17 }
  0x53   :  { %1159 = vmatmul.mubr.bf16.gmra.mrb[24].mxu0 %v2338_v22 }
  0x54   :  { %1256 = vmatmul.mubr.bf16.gmra.mrb[24].mxu1 %v2339_v23  ;;  %1166 = vmatprep.mubr.bf16.mxu0 %v2344_v24 }
  0x55   :  { %1263 = vmatprep.mubr.bf16.mxu1 %v2346_v25 }
  0x5b   :  { %1167 = vmatmul.mubr.bf16.gmra.mrb[28].mxu0 %v2348_v30 }
  0x5c   :  { %1264 = vmatmul.mubr.bf16.gmra.mrb[28].mxu1 %v2349_v31  ;;  %1304 = vmatprep.mubr.bf16.mxu0 %v2356_v33 }
  0x5d   :  { %1401 = vmatprep.mubr.bf16.mxu1 %v2359_v34 }
  0x63   :  { %1305 = vmatmul.mubr.bf16.vlgmr.msra.gmra.mrb[32].mxu0 %v2354_v35 }
  0x64   :  { %1402 = vmatmul.mubr.bf16.vlgmr.msra.gmra.mrb[32].mxu1 %v2357_v36  ;;  %2195 = vmatpush3.bf16.msra.mxu0 %v2360_v32 }
  0x65   :  { %2234 = vmatpush3.bf16.msra.mxu1 %v2360_v32  ;;  %1312 = vmatprep.mubr.bf16.mxu0 %v2361_v37 }
  0x66   :  { %1409 = vmatprep.mubr.bf16.mxu1 %v2363_v38  ;;  %2196 = vmatprep.subr.bf16.mxu0 %v2367_v39 }
  0x67   :  { %2227 = vmatprep.subr.bf16.mxu1 %v2367_v39 }
  0x68   :  { %2197 = vmatpush3.bf16.msra.mxu0 %v2367_v39 }
  0x69   :  { %2235 = vmatpush3.bf16.msra.mxu1 %v2367_v39  ;;  %2198 = vmatprep.subr.bf16.mxu0 %v2374_v40 }
  0x6a   :  { %2228 = vmatprep.subr.bf16.mxu1 %v2374_v40 }
  0x6b   :  { %1313 = vmatmul.mubr.bf16.gmra.mrb[36].mxu0 %v2365_v41 }
  0x6c   :  { %1410 = vmatmul.mubr.bf16.gmra.mrb[36].mxu1 %v2366_v42  ;;  %1320 = vmatprep.mubr.bf16.mxu0 %v2368_v43 }
  0x6d   :  { %1417 = vmatprep.mubr.bf16.mxu1 %v2370_v44  ;;  %2199 = vmatpush3.bf16.msra.mxu0 %v2374_v40 }
  0x6e   :  { %2236 = vmatpush3.bf16.msra.mxu1 %v2374_v40  ;;  %2200 = vmatprep.subr.bf16.mxu0 %v2381_v45 }
  0x6f   :  { %2229 = vmatprep.subr.bf16.mxu1 %v2381_v45 }
  0x71   :  { %2201 = vmatpush3.bf16.msra.mxu0 %v2381_v45 }
  0x72   :  { %2237 = vmatpush3.bf16.msra.mxu1 %v2381_v45  ;;  %2202 = vmatprep.subr.bf16.mxu0 %v2388_v46 }
  0x73   :  { %1321 = vmatmul.mubr.bf16.gmra.mrb[40].mxu0 %v2372_v47  ;;  %2230 = vmatprep.subr.bf16.mxu1 %v2388_v46 }
  0x74   :  { %1418 = vmatmul.mubr.bf16.gmra.mrb[40].mxu1 %v2373_v48  ;;  %1328 = vmatprep.mubr.bf16.mxu0 %v2375_v49 }
  0x75   :  { %1425 = vmatprep.mubr.bf16.mxu1 %v2377_v50  ;;  %2203 = vmatpush3.bf16.msra.mxu0 %v2388_v46 }
  0x76   :  { %2238 = vmatpush3.bf16.msra.mxu1 %v2388_v46  ;;  %2204 = vmatprep.subr.bf16.mxu0 %v2395_v51 }
  0x77   :  { %2231 = vmatprep.subr.bf16.mxu1 %v2395_v51 }
  0x79   :  { %2205 = vmatpush3.bf16.msra.mxu0 %v2395_v51 }
  0x7a   :  { %2239 = vmatpush3.bf16.msra.mxu1 %v2395_v51  ;;  %2206 = vmatprep.subr.bf16.mxu0 %v2402_v53 }
  0x7b   :  { %1329 = vmatmul.mubr.bf16.gmra.mrb[44].mxu0 %v2379_v52  ;;  %2232 = vmatprep.subr.bf16.mxu1 %v2402_v53 }
  0x7c   :  { %1426 = vmatmul.mubr.bf16.gmra.mrb[44].mxu1 %v2380_v54  ;;  %1336 = vmatprep.mubr.bf16.mxu0 %v2382_v55 }
  0x7d   :  { %1433 = vmatprep.mubr.bf16.mxu1 %v2384_v56  ;;  %2207 = vmatpush3.bf16.msra.mxu0 %v2402_v53 }
  0x7e   :  { %2240 = vmatpush3.bf16.msra.mxu1 %v2402_v53  ;;  %2208 = vmatprep.subr.bf16.mxu0 %v2409_v57 }
  0x7f   :  { %2233 = vmatprep.subr.bf16.mxu1 %v2409_v57 }
  0x81   :  { %2209 = vmatpush3.bf16.msra.mxu0 %v2409_v57 }
  0x82   :  { %2241 = vmatpush3.bf16.msra.mxu1 %v2409_v57 }
  0x83   :  { %1337 = vmatmul.mubr.bf16.gmra.mrb[48].mxu0 %v2386_v58 }
  0x84   :  { %1434 = vmatmul.mubr.bf16.gmra.mrb[48].mxu1 %v2387_v59  ;;  %1344 = vmatprep.mubr.bf16.mxu0 %v2389_v60 }
  0x85   :  { %1441 = vmatprep.mubr.bf16.mxu1 %v2391_v61 }
  0x8b   :  { %1345 = vmatmul.mubr.bf16.gmra.mrb[52].mxu0 %v2393_v62 }
  0x8c   :  { %1442 = vmatmul.mubr.bf16.gmra.mrb[52].mxu1 %v2394_v63  ;;  %1352 = vmatprep.mubr.bf16.mxu0 %v2396_v0 }
  0x8d   :  { %1449 = vmatprep.mubr.bf16.mxu1 %v2398_v1 }
  0x93   :  { %1353 = vmatmul.mubr.bf16.gmra.mrb[56].mxu0 %v2400_v2 }
  0x94   :  { %1450 = vmatmul.mubr.bf16.gmra.mrb[56].mxu1 %v2401_v3  ;;  %1360 = vmatprep.mubr.bf16.mxu0 %v2403_v4 }
  0x95   :  { %1457 = vmatprep.mubr.bf16.mxu1 %v2405_v5 }
  0x9b   :  { %1361 = vmatmul.mubr.bf16.gmra.mrb[60].mxu0 %v2407_v6 }
  0x9c   :  { %1458 = vmatmul.mubr.bf16.gmra.mrb[60].mxu1 %v2408_v7  ;;  %2210 = vmatprep.mubr.bf16.mxu0 %v2410_v8 }
  0x9d   :  { %2218 = vmatprep.mubr.bf16.mxu1 %v2411_v9 }
  0xa3   :  { %2211 = vmatmul.mubr.bf16.vlgmr.msra.gmra.mrb[64].mxu0 %v2412_v10 }
  0xa4   :  { %2219 = vmatmul.mubr.bf16.vlgmr.msra.gmra.mrb[64].mxu1 %v2413_v11  ;;  %2214 = vmatprep.mubr.bf16.mxu0 %v2414_v12 }
  0xa5   :  { %2222 = vmatprep.mubr.bf16.mxu1 %v2415_v13 }
  0xab   :  { %2215 = vmatmul.mubr.bf16.gmra.mrb[68].mxu0 %v2416_v14 }
  0xac   :  { %2223 = vmatmul.mubr.bf16.gmra.mrb[68].mxu1 %v2417_v15 }
  0xf6   :  { %v1938_v16 = vpop.f32.mrb[0].mxu0 }
  0xf7   :  { %v2002_v17 = vpop.f32.mrb[0].mxu1  ;;  %v1939_v18 = vpop.f32.mrb[1].mxu0 }
  0xf8   :  { %v1940_v19 = vadd.f32 %v1939_v18, %v1938_v16  ;;  %v2003_v20 = vpop.f32.mrb[1].mxu1  ;;  %v1941_v21 = vpop.f32.mrb[2].mxu0 }
  0xf9   :  { %v2004_v22 = vadd.f32 %v2003_v20, %v2002_v17  ;;  %v2005_v23 = vpop.f32.mrb[2].mxu1  ;;  %v1942_v24 = vpop.f32.mrb[3].mxu0 }
  0xfa   :  { %v1943_v25 = vadd.f32 %v1942_v24, %v1941_v21  ;;  %v2006_v26 = vpop.f32.mrb[3].mxu1 }
  0xfb   :  { %v2939_v27 = vadd.f32 %v2004_v22, %v1940_v19  ;;  %v2007_v28 = vadd.f32 %v2006_v26, %v2005_v23 }
  0xfd   :  { %v2941_v29 = vadd.f32 %v2007_v28, %v1943_v25 }
  0xfe   :  { %v1944_v30 = vpop.f32.mrb[4].mxu0 }
  0xff   :  { %v2008_v31 = vpop.f32.mrb[4].mxu1  ;;  %v1945_v32 = vpop.f32.mrb[5].mxu0 }
 0x100   :  { %v1946_v33 = vadd.f32 %v1945_v32, %v1944_v30  ;;  %v2009_v34 = vpop.f32.mrb[5].mxu1  ;;  %v1947_v35 = vpop.f32.mrb[6].mxu0 }
 0x101   :  { %v2010_v36 = vadd.f32 %v2009_v34, %v2008_v31  ;;  %v2011_v37 = vpop.f32.mrb[6].mxu1  ;;  %v1948_v38 = vpop.f32.mrb[7].mxu0 }
 0x102   :  { %v1949_v39 = vadd.f32 %v1948_v38, %v1947_v35  ;;  %v2012_v40 = vpop.f32.mrb[7].mxu1 }
 0x103   :  { %v2943_v41 = vadd.f32 %v2010_v36, %v1946_v33  ;;  %v2013_v42 = vadd.f32 %v2012_v40, %v2011_v37 }
 0x105   :  { %v2945_v43 = vadd.f32 %v2013_v42, %v1949_v39 }
 0x106   :  { %v1950_v44 = vpop.f32.mrb[8].mxu0 }
 0x107   :  { %v2014_v45 = vpop.f32.mrb[8].mxu1  ;;  %v1951_v46 = vpop.f32.mrb[9].mxu0 }
 0x108   :  { %v1952_v47 = vadd.f32 %v1951_v46, %v1950_v44  ;;  %v2015_v48 = vpop.f32.mrb[9].mxu1  ;;  %v1953_v49 = vpop.f32.mrb[10].mxu0 }
 0x109   :  { %v2016_v50 = vadd.f32 %v2015_v48, %v2014_v45  ;;  %v2017_v51 = vpop.f32.mrb[10].mxu1  ;;  %v1954_v52 = vpop.f32.mrb[11].mxu0 }
 0x10a   :  { %v1955_v53 = vadd.f32 %v1954_v52, %v1953_v49  ;;  %v2018_v54 = vpop.f32.mrb[11].mxu1 }
 0x10b   :  { %v2947_v55 = vadd.f32 %v2016_v50, %v1952_v47  ;;  %v2019_v56 = vadd.f32 %v2018_v54, %v2017_v51 }
 0x10d   :  { %v2949_v57 = vadd.f32 %v2019_v56, %v1955_v53 }
 0x10e   :  { %v1956_v58 = vpop.f32.mrb[12].mxu0 }
 0x10f   :  { %v2020_v59 = vpop.f32.mrb[12].mxu1  ;;  %v1957_v60 = vpop.f32.mrb[13].mxu0 }
 0x110   :  { %v1958_v61 = vadd.f32 %v1957_v60, %v1956_v58  ;;  %v2021_v62 = vpop.f32.mrb[13].mxu1  ;;  %v1959_v63 = vpop.f32.mrb[14].mxu0 }
 0x111   :  { %v2022_v0 = vadd.f32 %v2021_v62, %v2020_v59  ;;  %v2023_v1 = vpop.f32.mrb[14].mxu1  ;;  %v1960_v2 = vpop.f32.mrb[15].mxu0 }
 0x112   :  { %v1961_v3 = vadd.f32 %v1960_v2, %v1959_v63  ;;  %v2024_v4 = vpop.f32.mrb[15].mxu1 }
 0x113   :  { %v2951_v5 = vadd.f32 %v2022_v0, %v1958_v61  ;;  %v2025_v6 = vadd.f32 %v2024_v4, %v2023_v1 }
 0x115   :  { %v2953_v7 = vadd.f32 %v2025_v6, %v1961_v3 }
 0x116   :  { %v1962_v8 = vpop.f32.mrb[16].mxu0 }
 0x117   :  { %v2026_v9 = vpop.f32.mrb[16].mxu1  ;;  %v1963_v10 = vpop.f32.mrb[17].mxu0 }
 0x118   :  { %v1964_v11 = vadd.f32 %v1963_v10, %v1962_v8  ;;  %v2027_v12 = vpop.f32.mrb[17].mxu1  ;;  %v1965_v13 = vpop.f32.mrb[18].mxu0 }
 0x119   :  { %v2028_v14 = vadd.f32 %v2027_v12, %v2026_v9  ;;  %v2029_v15 = vpop.f32.mrb[18].mxu1  ;;  %v1966_v16 = vpop.f32.mrb[19].mxu0 }
 0x11a   :  { %v1967_v17 = vadd.f32 %v1966_v16, %v1965_v13  ;;  %v2030_v18 = vpop.f32.mrb[19].mxu1 }
 0x11b   :  { %v2955_v19 = vadd.f32 %v2028_v14, %v1964_v11  ;;  %v2031_v20 = vadd.f32 %v2030_v18, %v2029_v15 }
 0x11d   :  { %v2957_v21 = vadd.f32 %v2031_v20, %v1967_v17 }
 0x11e   :  { %v1968_v22 = vpop.f32.mrb[20].mxu0 }
 0x11f   :  { %v2032_v23 = vpop.f32.mrb[20].mxu1  ;;  %v1969_v24 = vpop.f32.mrb[21].mxu0 }
 0x120   :  { %v1970_v25 = vadd.f32 %v1969_v24, %v1968_v22  ;;  %v2033_v26 = vpop.f32.mrb[21].mxu1  ;;  %v1971_v28 = vpop.f32.mrb[22].mxu0 }
 0x121   :  { %v2034_v30 = vadd.f32 %v2033_v26, %v2032_v23  ;;  %v2035_v31 = vpop.f32.mrb[22].mxu1  ;;  %v1972_v32 = vpop.f32.mrb[23].mxu0 }
 0x122   :  { %v1973_v33 = vadd.f32 %v1972_v32, %v1971_v28  ;;  %v2036_v34 = vpop.f32.mrb[23].mxu1 }
 0x123   :  { %v2959_v35 = vadd.f32 %v2034_v30, %v1970_v25  ;;  %v2037_v36 = vadd.f32 %v2036_v34, %v2035_v31 }
 0x125   :  { %v2961_v37 = vadd.f32 %v2037_v36, %v1973_v33 }
 0x126   :  { %v1974_v38 = vpop.f32.mrb[24].mxu0 }
 0x127   :  { %v2038_v39 = vpop.f32.mrb[24].mxu1  ;;  %v1975_v40 = vpop.f32.mrb[25].mxu0 }
 0x128   :  { %v1976_v42 = vadd.f32 %v1975_v40, %v1974_v38  ;;  %v2039_v44 = vpop.f32.mrb[25].mxu1  ;;  %v1977_v45 = vpop.f32.mrb[26].mxu0 }
 0x129   :  { %v2040_v46 = vadd.f32 %v2039_v44, %v2038_v39  ;;  %v2041_v47 = vpop.f32.mrb[26].mxu1  ;;  %v1978_v48 = vpop.f32.mrb[27].mxu0 }
 0x12a   :  { %v1979_v49 = vadd.f32 %v1978_v48, %v1977_v45  ;;  %v2042_v50 = vpop.f32.mrb[27].mxu1 }
 0x12b   :  { %v2963_v51 = vadd.f32 %v2040_v46, %v1976_v42  ;;  %v2043_v52 = vadd.f32 %v2042_v50, %v2041_v47 }
 0x12d   :  { %v2965_v53 = vadd.f32 %v2043_v52, %v1979_v49 }
 0x12e   :  { %v1980_v54 = vpop.f32.mrb[28].mxu0 }
 0x12f   :  { %v2044_v56 = vpop.f32.mrb[28].mxu1  ;;  %v1981_v58 = vpop.f32.mrb[29].mxu0 }
 0x130   :  { %v1982_v59 = vadd.f32 %v1981_v58, %v1980_v54  ;;  %v2045_v60 = vpop.f32.mrb[29].mxu1  ;;  %v1983_v61 = vpop.f32.mrb[30].mxu0 }
 0x131   :  { %v2046_v62 = vadd.f32 %v2045_v60, %v2044_v56  ;;  %v2047_v63 = vpop.f32.mrb[30].mxu1  ;;  %v1984_v0 = vpop.f32.mrb[31].mxu0 }
 0x132   :  { %v1985_v1 = vadd.f32 %v1984_v0, %v1983_v61  ;;  %v2048_v2 = vpop.f32.mrb[31].mxu1 }
 0x133   :  { %v2967_v3 = vadd.f32 %v2046_v62, %v1982_v59  ;;  %v2049_v4 = vadd.f32 %v2048_v2, %v2047_v63 }
 0x135   :  { %v2969_v6 = vadd.f32 %v2049_v4, %v1985_v1 }
 0x136   :  { %v2066_v8 = vpop.f32.mrb[32].mxu0 }
 0x137   :  { %v2130_v9 = vpop.f32.mrb[32].mxu1  ;;  %v2067_v10 = vpop.f32.mrb[33].mxu0 }
 0x138   :  { %v2068_v11 = vadd.f32 %v2067_v10, %v2066_v8  ;;  %v2131_v12 = vpop.f32.mrb[33].mxu1  ;;  %v2069_v13 = vpop.f32.mrb[34].mxu0 }
 0x139   :  { %v2132_v14 = vadd.f32 %v2131_v12, %v2130_v9  ;;  %v2133_v15 = vpop.f32.mrb[34].mxu1  ;;  %v2070_v16 = vpop.f32.mrb[35].mxu0 }
 0x13a   :  { %v1307_v17 = vadd.f32 %v2068_v11, %v2939_v27  ;;  %v2071_v18 = vadd.f32 %v2070_v16, %v2069_v13  ;;  %v2134_v20 = vpop.f32.mrb[35].mxu1 }
 0x13b   :  { %v2135_v22 = vadd.f32 %v2134_v20, %v2133_v15 }
 0x13c   :  { %v1310_v23 = vadd.f32 %v2071_v18, %v2941_v29  ;;  %v2973_v24 = vadd.f32 %v2132_v14, %v1307_v17 }
 0x13e   :  { %v2072_v25 = vpop.f32.mrb[36].mxu0  ;;  %v2975_v26 = vadd.f32 %v2135_v22, %v1310_v23 }
 0x13f   :  { %v2136_v28 = vpop.f32.mrb[36].mxu1  ;;  %v2073_v30 = vpop.f32.mrb[37].mxu0 }
 0x140   :  { %v2074_v31 = vadd.f32 %v2073_v30, %v2072_v25  ;;  %v2137_v32 = vpop.f32.mrb[37].mxu1  ;;  %v2075_v33 = vpop.f32.mrb[38].mxu0 }
 0x141   :  { %v2138_v34 = vadd.f32 %v2137_v32, %v2136_v28  ;;  %v2139_v36 = vpop.f32.mrb[38].mxu1  ;;  %v2076_v38 = vpop.f32.mrb[39].mxu0 }
 0x142   :  { %v1315_v27 = vadd.f32 %v2074_v31, %v2943_v41  ;;  %v2077_v39 = vadd.f32 %v2076_v38, %v2075_v33  ;;  %v2140_v40 = vpop.f32.mrb[39].mxu1 }
 0x143   :  { %v2141_v42 = vadd.f32 %v2140_v40, %v2139_v36 }
 0x144   :  { %v1318_v29 = vadd.f32 %v2077_v39, %v2945_v43  ;;  %v2979_v44 = vadd.f32 %v2138_v34, %v1315_v27 }
 0x146   :  { %v2078_v45 = vpop.f32.mrb[40].mxu0  ;;  %v2981_v46 = vadd.f32 %v2141_v42, %v1318_v29 }
 0x147   :  { %v2142_v47 = vpop.f32.mrb[40].mxu1  ;;  %v2079_v48 = vpop.f32.mrb[41].mxu0 }
 0x148   :  { %v2080_v49 = vadd.f32 %v2079_v48, %v2078_v45  ;;  %v2143_v50 = vpop.f32.mrb[41].mxu1  ;;  %v2081_v52 = vpop.f32.mrb[42].mxu0 }
 0x149   :  { %v2144_v54 = vadd.f32 %v2143_v50, %v2142_v47  ;;  %v2145_v56 = vpop.f32.mrb[42].mxu1  ;;  %v2082_v58 = vpop.f32.mrb[43].mxu0 }
 0x14a   :  { %v1323_v41 = vadd.f32 %v2080_v49, %v2947_v55  ;;  %v2083_v59 = vadd.f32 %v2082_v58, %v2081_v52  ;;  %v2146_v60 = vpop.f32.mrb[43].mxu1 }
 0x14b   :  { %v2147_v61 = vadd.f32 %v2146_v60, %v2145_v56 }
 0x14c   :  { %v1326_v43 = vadd.f32 %v2083_v59, %v2949_v57  ;;  %v2985_v62 = vadd.f32 %v2144_v54, %v1323_v41 }
 0x14e   :  { %v2084_v63 = vpop.f32.mrb[44].mxu0  ;;  %v2987_v0 = vadd.f32 %v2147_v61, %v1326_v43 }
 0x14f   :  { %v2148_v1 = vpop.f32.mrb[44].mxu1  ;;  %v2085_v2 = vpop.f32.mrb[45].mxu0 }
 0x150   :  { %v2086_v4 = vadd.f32 %v2085_v2, %v2084_v63  ;;  %v2149_v8 = vpop.f32.mrb[45].mxu1  ;;  %v2087_v9 = vpop.f32.mrb[46].mxu0 }
 0x151   :  { %v2150_v10 = vadd.f32 %v2149_v8, %v2148_v1  ;;  %v2151_v11 = vpop.f32.mrb[46].mxu1  ;;  %v2088_v12 = vpop.f32.mrb[47].mxu0 }
 0x152   :  { %v1331_v55 = vadd.f32 %v2086_v4, %v2951_v5  ;;  %v2089_v13 = vadd.f32 %v2088_v12, %v2087_v9  ;;  %v2152_v14 = vpop.f32.mrb[47].mxu1 }
 0x153   :  { %v2153_v15 = vadd.f32 %v2152_v14, %v2151_v11 }
 0x154   :  { %v1334_v57 = vadd.f32 %v2089_v13, %v2953_v7  ;;  %v2991_v16 = vadd.f32 %v2150_v10, %v1331_v55 }
 0x156   :  { %v2090_v17 = vpop.f32.mrb[48].mxu0  ;;  %v2993_v18 = vadd.f32 %v2153_v15, %v1334_v57 }
 0x157   :  { %v2154_v20 = vpop.f32.mrb[48].mxu1  ;;  %v2091_v22 = vpop.f32.mrb[49].mxu0 }
 0x158   :  { %v2092_v23 = vadd.f32 %v2091_v22, %v2090_v17  ;;  %v2155_v25 = vpop.f32.mrb[49].mxu1  ;;  %v2093_v28 = vpop.f32.mrb[50].mxu0 }
 0x159   :  { %v2156_v30 = vadd.f32 %v2155_v25, %v2154_v20  ;;  %v2157_v31 = vpop.f32.mrb[50].mxu1  ;;  %v2094_v32 = vpop.f32.mrb[51].mxu0 }
 0x15a   :  { %v1339_v5 = vadd.f32 %v2092_v23, %v2955_v19  ;;  %v2095_v33 = vadd.f32 %v2094_v32, %v2093_v28  ;;  %v2158_v34 = vpop.f32.mrb[51].mxu1 }
 0x15b   :  { %v2159_v36 = vadd.f32 %v2158_v34, %v2157_v31 }
 0x15c   :  { %v1342_v7 = vadd.f32 %v2095_v33, %v2957_v21  ;;  %v2997_v38 = vadd.f32 %v2156_v30, %v1339_v5  ;;  %v3016_v33 = vld [vmem:[%s3185_s2] ss:$0 sm:$0xff] }
 0x15e   :  { %v2096_v27 = vpop.f32.mrb[52].mxu0  ;;  %v2999_v39 = vadd.f32 %v2159_v36, %v1342_v7 }
 0x15f   :  { %v2160_v40 = vpop.f32.mrb[52].mxu1  ;;  %v2097_v42 = vpop.f32.mrb[53].mxu0 }
 0x160   :  { %v2098_v29 = vadd.f32 %v2097_v42, %v2096_v27  ;;  %v2161_v45 = vpop.f32.mrb[53].mxu1  ;;  %v2099_v47 = vpop.f32.mrb[54].mxu0 }
 0x161   :  { %v2162_v48 = vadd.f32 %v2161_v45, %v2160_v40  ;;  %v2163_v49 = vpop.f32.mrb[54].mxu1  ;;  %v2100_v50 = vpop.f32.mrb[55].mxu0 }
 0x162   :  { %v1347_v19 = vadd.f32 %v2098_v29, %v2959_v35  ;;  %v2101_v52 = vadd.f32 %v2100_v50, %v2099_v47  ;;  %v2164_v54 = vpop.f32.mrb[55].mxu1 }
 0x163   :  { %v2165_v56 = vadd.f32 %v2164_v54, %v2163_v49 }
 0x164   :  { %v1350_v21 = vadd.f32 %v2101_v52, %v2961_v37  ;;  %v1444_v58 = vadd.f32 %v2162_v48, %v1347_v19 }
 0x166   :  { %v2102_v41 = vpop.f32.mrb[56].mxu0  ;;  %v1447_v59 = vadd.f32 %v2165_v56, %v1350_v21 }
 0x167   :  { %v2166_v60 = vpop.f32.mrb[56].mxu1  ;;  %v2103_v61 = vpop.f32.mrb[57].mxu0 }
 0x168   :  { %v2104_v43 = vadd.f32 %v2103_v61, %v2102_v41  ;;  %v2167_v63 = vpop.f32.mrb[57].mxu1  ;;  %v2105_v1 = vpop.f32.mrb[58].mxu0 }
 0x169   :  { %v2168_v2 = vadd.f32 %v2167_v63, %v2166_v60  ;;  %v2169_v4 = vpop.f32.mrb[58].mxu1  ;;  %v2106_v8 = vpop.f32.mrb[59].mxu0 }
 0x16a   :  { %v1355_v9 = vadd.f32 %v2104_v43, %v2963_v51  ;;  %v2107_v10 = vadd.f32 %v2106_v8, %v2105_v1  ;;  %v2170_v35 = vpop.f32.mrb[59].mxu1 }
 0x16b   :  { %v2171_v11 = vadd.f32 %v2170_v35, %v2169_v4 }
 0x16c   :  { %v1358_v12 = vadd.f32 %v2107_v10, %v2965_v53  ;;  %v3005_v55 = vadd.f32 %v2168_v2, %v1355_v9 }
 0x16e   :  { %v2108_v37 = vpop.f32.mrb[60].mxu0  ;;  %v3007_v13 = vadd.f32 %v2171_v11, %v1358_v12 }
 0x16f   :  { %v2172_v14 = vpop.f32.mrb[60].mxu1  ;;  %v2109_v15 = vpop.f32.mrb[61].mxu0 }
 0x170   :  { %v2110_v57 = vadd.f32 %v2109_v15, %v2108_v37  ;;  %v2173_v17 = vpop.f32.mrb[61].mxu1  ;;  %v2111_v20 = vpop.f32.mrb[62].mxu0 }
 0x171   :  { %v2174_v22 = vadd.f32 %v2173_v17, %v2172_v14  ;;  %v2175_v23 = vpop.f32.mrb[62].mxu1  ;;  %v2112_v25 = vpop.f32.mrb[63].mxu0 }
 0x172   :  { %v1363_v51 = vadd.f32 %v2110_v57, %v2967_v3  ;;  %v2113_v28 = vadd.f32 %v2112_v25, %v2111_v20  ;;  %v2176_v30 = vpop.f32.mrb[63].mxu1  ;;  %v3024_v3 = vld [vmem:[%s3186_s3] ss:$0 sm:$0xff] }
 0x173   :  { %v2177_v31 = vadd.f32 %v2176_v30, %v2175_v23 }
 0x174   :  { %v1366_v53 = vadd.f32 %v2113_v28, %v2969_v6  ;;  %v3011_v32 = vadd.f32 %v2174_v22, %v1363_v51 }
 0x176   :  { %v2212_v5 = vpop.f32.mrb[64].mxu0  ;;  %v3018_v34 = vadd.f32 %v2177_v31, %v1366_v53 }
 0x177   :  { %v1509_v36 = vadd.f32 %v2212_v5, %v2979_v44  ;;  %v2220_v7 = vpop.f32.mrb[64].mxu1  ;;  %v1500_v27 = vpop.f32.mrb[65].mxu0 }
 0x178   :  { %v1541_v6 = vadd.f32 %v2220_v7, %v1444_v58  ;;  %v1501_v40 = vadd.f32 %v1500_v27, %v2973_v24  ;;  %v1532_v42 = vpop.f32.mrb[65].mxu1  ;;  %v2213_v29 = vpop.f32.mrb[66].mxu0 }
 0x179   :  { %v1623_v45 = vmul.f32 %v3016_v33, %v1509_v36  ;;  %v1533_v47 = vadd.f32 %v1532_v42, %v2997_v38  ;;  %v1512_v48 = vadd.f32 %v2213_v29, %v2981_v46  ;;  %v2221_v49 = vpop.f32.mrb[66].mxu1  ;;  %v1503_v44 = vpop.f32.mrb[67].mxu0 }
 0x17a   :  { %v1631_v50 = vmul.f32 %v3016_v33, %v1541_v6  ;;  %v1621_v19 = vmul.f32 %v3016_v33, %v1501_v40  ;;  %v1544_v52 = vadd.f32 %v2221_v49, %v1447_v59  ;;  %v1504_v54 = vadd.f32 %v1503_v44, %v2975_v26  ;;  %v1535_v56 = vpop.f32.mrb[67].mxu1 }
 0x17b   :  { %v3034_v24 = vadd.f32 %v3024_v3, %v1623_v45  ;;  %v1629_v21 = vmul.f32 %v3016_v33, %v1533_v47  ;;  %v1624_v58 = vmul.f32 %v3016_v33, %v1512_v48  ;;  %v1536_v38 = vadd.f32 %v1535_v56, %v2999_v39 }
 0x17c   :  { %v3040_v46 = vadd.f32 %v3024_v3, %v1631_v50  ;;  %v3043_v41 = vadd.f32 %v3024_v3, %v1621_v19  ;;  %v1632_v59 = vmul.f32 %v3016_v33, %v1544_v52  ;;  %v1622_v26 = vmul.f32 %v3016_v33, %v1504_v54 }
 0x17d   :  { %v1662_v60 = vsub.f32 0.0, %v3034_v24  ;;  %v3049_v61 = vadd.f32 %v3024_v3, %v1629_v21  ;;  %v3052_v43 = vadd.f32 %v3024_v3, %v1624_v58  ;;  %v1630_v39 = vmul.f32 %v3016_v33, %v1536_v38 }
 0x17e   :  { %v1670_v63 = vsub.f32 0.0, %v3040_v46  ;;  %v1660_v1 = vsub.f32 0.0, %v3043_v41  ;;  %v3058_v2 = vadd.f32 %v3024_v3, %v1632_v59  ;;  %v3061_v4 = vadd.f32 %v3024_v3, %v1622_v26  ;;  %v2216_v8 = vpop.f32.mrb[68].mxu0 }
 0x17f   :  { %v1680_v9 = vmul.f32 1.442695, %v1662_v60  ;;  %v1668_v10 = vsub.f32 0.0, %v3049_v61  ;;  %v1663_v35 = vsub.f32 0.0, %v3052_v43  ;;  %v3066_v11 = vadd.f32 %v3024_v3, %v1630_v39  ;;  %v2224_v12 = vpop.f32.mrb[68].mxu1  ;;  %v1516_v37 = vpop.f32.mrb[69].mxu0 }
 0x180   :  { %v1696_v14 = vmul.f32 1.442695, %v1670_v63  ;;  %v1676_v15 = vmul.f32 1.442695, %v1660_v1  ;;  %v1671_v57 = vsub.f32 0.0, %v3058_v2  ;;  %v1661_v17 = vsub.f32 0.0, %v3061_v4 }
 0x181   :  { %2418 = vpow2.f32 %v1680_v9  ;;  %v1692_v20 = vmul.f32 1.442695, %v1668_v10  ;;  %v1682_v22 = vmul.f32 1.442695, %v1663_v35  ;;  %v1669_v23 = vsub.f32 0.0, %v3066_v11  ;;  %v1548_v25 = vpop.f32.mrb[69].mxu1 }
 0x182   :  { %2420 = vpow2.f32 %v1696_v14  ;;  %v1698_v51 = vmul.f32 1.442695, %v1671_v57  ;;  %v1678_v28 = vmul.f32 1.442695, %v1661_v17  ;;  %v1525_v30 = vadd.f32 %v2216_v8, %v2991_v16  ;;  %v2217_v31 = vpop.f32.mrb[70].mxu0  ;;  %v2225_v53 = vpop.f32.mrb[70].mxu1 }
 0x183   :  { %2422 = vpow2.f32 %v1676_v15  ;;  %v1694_v5 = vmul.f32 1.442695, %v1669_v23  ;;  %v1557_v36 = vadd.f32 %v2224_v12, %v3011_v32  ;;  %v1517_v7 = vadd.f32 %v1516_v37, %v2985_v62  ;;  %v1519_v27 = vpop.f32.mrb[71].mxu0  ;;  %v1551_v6 = vpop.f32.mrb[71].mxu1 }
 0x184   :  { %2424 = vpow2.f32 %v1692_v20  ;;  %v1627_v40 = vmul.f32 %v3016_v33, %v1525_v30  ;;  %v1549_v42 = vadd.f32 %v1548_v25, %v3005_v55  ;;  %v1528_v29 = vadd.f32 %v2217_v31, %v2993_v18 }
 0x185   :  { %2426 = vpow2.f32 %v1682_v22  ;;  %v1635_v16 = vmul.f32 %v3016_v33, %v1557_v36  ;;  %v1560_v45 = vadd.f32 %v2225_v53, %v3018_v34  ;;  %v1625_v62 = vmul.f32 %v3016_v33, %v1517_v7 }
 0x186   :  { %2428 = vpow2.f32 %v1698_v51  ;;  %v3080_v47 = vadd.f32 %v3024_v3, %v1627_v40  ;;  %v1633_v48 = vmul.f32 %v3016_v33, %v1549_v42  ;;  %v1628_v55 = vmul.f32 %v3016_v33, %v1528_v29 }
 0x187   :  { %2430 = vpow2.f32 %v1678_v28  ;;  %v3084_v32 = vadd.f32 %v3024_v3, %v1635_v16  ;;  %v1520_v34 = vadd.f32 %v1519_v27, %v2987_v0  ;;  %v3092_v50 = vadd.f32 %v3024_v3, %v1625_v62 }
 0x188   :  { %2432 = vpow2.f32 %v1694_v5  ;;  %v1666_v18 = vsub.f32 0.0, %v3080_v47  ;;  %v1552_v19 = vadd.f32 %v1551_v6, %v3007_v13  ;;  %v3096_v56 = vadd.f32 %v3024_v3, %v1633_v48 }
 0x189   :  { %v1674_v49 = vsub.f32 0.0, %v3084_v32  ;;  %v1636_v21 = vmul.f32 %v3016_v33, %v1560_v45  ;;  %v3100_v59 = vadd.f32 %v3024_v3, %v1628_v55  ;;  %v1626_v0 = vmul.f32 %v3016_v33, %v1520_v34 }
 0x18a   :  { %v1688_v44 = vmul.f32 1.442695, %v1666_v18  ;;  %v1664_v63 = vsub.f32 0.0, %v3092_v50  ;;  %v1634_v1 = vmul.f32 %v3016_v33, %v1552_v19  ;;  %v1672_v10 = vsub.f32 0.0, %v3096_v56 }
 0x18b   :  { %v2419_v52 = vpop.eup %2418  ;;  %v1704_v54 = vmul.f32 1.442695, %v1674_v49  ;;  %v3107_v35 = vadd.f32 %v3024_v3, %v1636_v21  ;;  %v1667_v14 = vsub.f32 0.0, %v3100_v59  ;;  %v3111_v15 = vadd.f32 %v3024_v3, %v1626_v0 }
 0x18c   :  { %v2421_v58 = vpop.eup %2420  ;;  %v1710_v38 = vadd.f32 1.0, %v2419_v52  ;;  %2434 = vpow2.f32 %v1688_v44  ;;  %v3114_v33 = vadd.f32 %v3024_v3, %v1634_v1  ;;  %v1684_v23 = vmul.f32 1.442695, %v1664_v63 }
 0x18d   :  { %v2423_v26 = vpop.eup %2422  ;;  %v1718_v60 = vadd.f32 1.0, %v2421_v58  ;;  %2436 = vpow2.f32 %v1704_v54  ;;  %v1700_v51 = vmul.f32 1.442695, %v1672_v10  ;;  %v1675_v28 = vsub.f32 0.0, %v3107_v35 }
 0x18e   :  { %v2425_v39 = vpop.eup %2424  ;;  %2438 = vrcp.f32 %v1710_v38  ;;  %v1708_v13 = vadd.f32 1.0, %v2423_v26  ;;  %v1690_v30 = vmul.f32 1.442695, %v1667_v14  ;;  %v1665_v31 = vsub.f32 0.0, %v3111_v15 }
 0x18f   :  { %v2427_v8 = vpop.eup %2426  ;;  %2440 = vrcp.f32 %v1718_v60  ;;  %v1716_v9 = vadd.f32 1.0, %v2425_v39  ;;  %v1673_v53 = vsub.f32 0.0, %v3114_v33  ;;  %v1706_v7 = vmul.f32 1.442695, %v1675_v28 }
 0x190   :  { %v2429_v12 = vpop.eup %2428  ;;  %2442 = vrcp.f32 %v1708_v13  ;;  %v1711_v37 = vadd.f32 1.0, %v2427_v8  ;;  %v1686_v40 = vmul.f32 1.442695, %v1665_v31 }
 0x191   :  { %v2431_v57 = vpop.eup %2430  ;;  %2444 = vrcp.f32 %v1716_v9  ;;  %v1719_v17 = vadd.f32 1.0, %v2429_v12  ;;  %v1702_v16 = vmul.f32 1.442695, %v1673_v53 }
 0x192   :  { %v2433_v20 = vpop.eup %2432  ;;  %2446 = vrcp.f32 %v1711_v37  ;;  %v1709_v22 = vadd.f32 1.0, %v2431_v57 }
 0x193   :  { %2448 = vrcp.f32 %v1719_v17  ;;  %v1717_v25 = vadd.f32 1.0, %v2433_v20 }
 0x194   :  { %2450 = vrcp.f32 %v1709_v22 }
 0x195   :  { %2452 = vrcp.f32 %v1717_v25 }
 0x196   :  { %v2435_v5 = vpop.eup %2434  ;;  %2454 = vpow2.f32 %v1684_v23 }
 0x197   :  { %v2437_v3 = vpop.eup %2436  ;;  %v1714_v36 = vadd.f32 1.0, %v2435_v5  ;;  %2456 = vpow2.f32 %v1700_v51 }
 0x198   :  { %v2439_v27 = vpop.eup %2438  ;;  %v1722_v6 = vadd.f32 1.0, %v2437_v3  ;;  %2458 = vpow2.f32 %v1690_v30 }
 0x199   :  { %v2441_v42 = vpop.eup %2440  ;;  %v1742_v29 = vmul.f32 %v2439_v27, %v3034_v24  ;;  %2460 = vrcp.f32 %v1714_v36 }
 0x19a   :  { %v2443_v45 = vpop.eup %2442  ;;  %v1750_v62 = vmul.f32 %v2441_v42, %v3040_v46  ;;  %2462 = vrcp.f32 %v1722_v6 }
 0x19b   :  { %v2445_v48 = vpop.eup %2444  ;;  %1758 = vst [vmem:[%s3187_s4 + $0x10] sm:$0xff] %v1742_v29  ;;  %v1740_v18 = vmul.f32 %v2443_v45, %v3043_v41  ;;  %2464 = vpow2.f32 %v1706_v7 }
 0x19c   :  { %v2447_v55 = vpop.eup %2446  ;;  %1766 = vst [vmem:[%s3187_s4 + $0x50] sm:$0xff] %v1750_v62  ;;  %v1748_v24 = vmul.f32 %v2445_v48, %v3049_v61  ;;  %2466 = vpow2.f32 %v1686_v40 }
 0x19d   :  { %v2449_v49 = vpop.eup %2448  ;;  %1756 = vst [vmem:[%s3187_s4] sm:$0xff] %v1740_v18  ;;  %v1743_v46 = vmul.f32 %v2447_v55, %v3052_v43  ;;  %2468 = vpow2.f32 %v1702_v16 }
 0x19e   :  { %v2451_v34 = vpop.eup %2450  ;;  %1764 = vst [vmem:[%s3187_s4 + $0x40] sm:$0xff] %v1748_v24  ;;  %v1751_v41 = vmul.f32 %v2449_v49, %v3058_v2 }
 0x19f   :  { %v2453_v44 = vpop.eup %2452  ;;  %1759 = vst [vmem:[%s3187_s4 + $0x18] sm:$0xff] %v1743_v46  ;;  %v1741_v61 = vmul.f32 %v2451_v34, %v3061_v4 }
 0x1a0   :  { %v2455_v19 = vpop.eup %2454  ;;  %1767 = vst [vmem:[%s3187_s4 + $0x58] sm:$0xff] %v1751_v41  ;;  %v1749_v43 = vmul.f32 %v2453_v44, %v3066_v11 }
 0x1a1   :  { %v2457_v52 = vpop.eup %2456  ;;  %1757 = vst [vmem:[%s3187_s4 + $0x8] sm:$0xff] %v1741_v61  ;;  %v1712_v2 = vadd.f32 1.0, %v2455_v19 }
 0x1a2   :  { %v2459_v54 = vpop.eup %2458  ;;  %1765 = vst [vmem:[%s3187_s4 + $0x48] sm:$0xff] %v1749_v43  ;;  %v1720_v21 = vadd.f32 1.0, %v2457_v52 }
 0x1a3   :  { %v2461_v4 = vpop.eup %2460  ;;  %2470 = vrcp.f32 %v1712_v2  ;;  %v1715_v58 = vadd.f32 1.0, %v2459_v54 }
 0x1a4   :  { %v2463_v38 = vpop.eup %2462  ;;  %v1746_v0 = vmul.f32 %v2461_v4, %v3080_v47  ;;  %2472 = vrcp.f32 %v1720_v21 }
 0x1a5   :  { %v2465_v11 = vpop.eup %2464  ;;  %v1754_v26 = vmul.f32 %v2463_v38, %v3084_v32  ;;  %2474 = vrcp.f32 %v1715_v58 }
 0x1a6   :  { %v2467_v60 = vpop.eup %2466  ;;  %1762 = vst [vmem:[%s3187_s4 + $0x30] sm:$0xff] %v1746_v0  ;;  %v1723_v39 = vadd.f32 1.0, %v2465_v11 }
 0x1a7   :  { %v2469_v13 = vpop.eup %2468  ;;  %1770 = vst [vmem:[%s3187_s4 + $0x70] sm:$0xff] %v1754_v26  ;;  %v1713_v63 = vadd.f32 1.0, %v2467_v60 }
 0x1a8   :  { %2476 = vrcp.f32 %v1723_v39  ;;  %v1721_v1 = vadd.f32 1.0, %v2469_v13 }
 0x1a9   :  { %2478 = vrcp.f32 %v1713_v63 }
 0x1aa   :  { %2480 = vrcp.f32 %v1721_v1 }
 0x1ad   :  { %v2471_v47 = vpop.eup %2470 }
 0x1ae   :  { %v2473_v8 = vpop.eup %2472  ;;  %v1744_v32 = vmul.f32 %v2471_v47, %v3092_v50 }
 0x1af   :  { %v2475_v9 = vpop.eup %2474  ;;  %v1752_v10 = vmul.f32 %v2473_v8, %v3096_v56 }
 0x1b0   :  { %1760 = vst [vmem:[%s3187_s4 + $0x20] sm:$0xff] %v1744_v32  ;;  %v1747_v12 = vmul.f32 %v2475_v9, %v3100_v59 }
 0x1b1   :  { %1768 = vst [vmem:[%s3187_s4 + $0x60] sm:$0xff] %v1752_v10 }
 0x1b2   :  { %v2477_v37 = vpop.eup %2476  ;;  %1763 = vst [vmem:[%s3187_s4 + $0x38] sm:$0xff] %v1747_v12 }
 0x1b3   :  { %v2479_v14 = vpop.eup %2478  ;;  %v1755_v50 = vmul.f32 %v2477_v37, %v3107_v35 }
 0x1b4   :  { %v2481_v57 = vpop.eup %2480  ;;  %v1745_v56 = vmul.f32 %v2479_v14, %v3111_v15 }
 0x1b5   :  { %1771 = vst [vmem:[%s3187_s4 + $0x78] sm:$0xff] %v1755_v50  ;;  %v1753_v59 = vmul.f32 %v2481_v57, %v3114_v33 }
 0x1b6   :  { %1761 = vst [vmem:[%s3187_s4 + $0x28] sm:$0xff] %v1745_v56 }
 0x1b7   :  { %1769 = vst [vmem:[%s3187_s4 + $0x68] sm:$0xff] %v1753_v59 }

</bundles_post_ra>
